<compile_context>
chip_gen: v7x
topology: tpu7x:2x2x1
jax: 0.10.0
libtpu: 0.0.40
codegen_flags: <defaults>
</compile_context>

<pallas_src>
import functools

import jax
import jax.numpy as jnp
from jax.experimental import pallas as pl
from jax.experimental.pallas import tpu as pltpu

LATENT_DIM = 32
MAX_BLOCK_B = 1024   # max batch rows per grid step (multiple of 8)


def _round_up(a, m):
    return (a + m - 1) // m * m


def _act_dtype():
    """bf16 inter-layer chain only where the VALUs support bf16 (v6e / v7x)."""
    try:
        kind = jax.devices()[0].device_kind.lower()
    except Exception:
        kind = ""
    if any(tag in kind for tag in ("v6", "v7", "7x")):
        return jnp.bfloat16
    return jnp.float32


def _choose_tiling(B):
    """Pick (Bt, B_pad).  Bt is a multiple of 8, capped at MAX_BLOCK_B; the step
    count is even (>=2) whenever B is large enough so v7x's two TensorCores both
    get work, and padding waste stays bounded by a few rows per step."""
    B8 = _round_up(B, 8)
    if B8 < 16:                       # too small to split usefully
        return B8, B8
    n_steps = max(2, pl.cdiv(B8, MAX_BLOCK_B))
    if n_steps % 2:
        n_steps += 1                  # even step count -> balanced v7x cores
    Bt = _round_up(pl.cdiv(B8, n_steps), 8)
    return Bt, Bt * n_steps


def fcae_kernel(x_ref, w_ref, b_ref, out_ref, *,
                enc_dims, dec_dims, ic_dim, latent, out_pad, act_dtype):
    """x_ref: (Bt, in_flat) f32.  w_ref: (13, Din, Dout) bf16 slab.
    b_ref: (12, Dout) act_dtype slab.  out_ref: (Bt, P) f32 packed [out|z|pad]."""

    def linear(h, w_idx, b_idx, din, dout, relu):
        w = w_ref[w_idx, :din, :dout]            # static slice, bf16, real shape
        b = b_ref[b_idx:b_idx + 1, :dout]        # (1, dout) in act_dtype
        y = jnp.dot(h.astype(jnp.bfloat16), w,
                    preferred_element_type=act_dtype) + b
        return jnp.maximum(y, 0) if relu else y

    x = x_ref[...]                               # (Bt, in_flat) f32
    rows, in_flat = x.shape
    ic = x[:, :ic_dim]                           # == x[:, 0, :] after flatten

    # ---- encoder: in_flat -> 256 -> 256 -> 256 -> 128 -> 128 -> latent ------
    n_enc = len(enc_dims)
    h = x
    for l, (din, dout) in enumerate(enc_dims):
        h = linear(h, l, l, din, dout, relu=(l < n_enc - 1))
    z = h                                        # (Bt, latent)

    # ---- decoder layer 0: concat(z, ic) @ W == z @ W[:latent] + ic @ W[latent:]
    d0_in, d0_out = dec_dims[0]
    wz = w_ref[n_enc, :latent, :d0_out]
    wic = w_ref[n_enc + 1, :d0_in - latent, :d0_out]
    d = (jnp.dot(z.astype(jnp.bfloat16), wz, preferred_element_type=act_dtype)
         + jnp.dot(ic.astype(jnp.bfloat16), wic, preferred_element_type=act_dtype)
         + b_ref[n_enc:n_enc + 1, :d0_out])
    d = jnp.maximum(d, 0)

    # ---- decoder layers 1..5: 128 -> 128 -> 256 -> 256 -> 256 -> in_flat -----
    n_dec = len(dec_dims)
    for l in range(1, n_dec):
        din, dout = dec_dims[l]
        d = linear(d, n_enc + 1 + l, n_enc + l, din, dout,
                   relu=(l < n_dec - 1))

    # ---- lane-dense packed writeback: [ out | z | zero pad ] -----------------
    # Direct stores into the (Bt, 128k) output block; no per-step concatenate /
    # zero-slab re-materialization.
    out_ref[:, :in_flat] = d.astype(out_ref.dtype)
    out_ref[:, in_flat:in_flat + latent] = z.astype(out_ref.dtype)
    if out_pad:
        out_ref[:, in_flat + latent:] = jnp.zeros((rows, out_pad), out_ref.dtype)


def init_params(key, in_flat, ic_dim, latent=LATENT_DIM):
    """Deterministic synthetic weights.  W stored as (in, out) = PyTorch W.T."""
    enc_dims = [in_flat, 256, 256, 256, 128, 128, latent]
    dec_dims = [latent + ic_dim, 128, 128, 256, 256, 256, in_flat]

    def layer(k, din, dout):
        kw, kb = jax.random.split(k)
        scale = 1.0 / jnp.sqrt(jnp.float32(din))
        w = jax.random.uniform(kw, (din, dout), jnp.float32, -scale, scale)
        b = jax.random.uniform(kb, (dout,), jnp.float32, -scale, scale)
        return w, b

    keys = jax.random.split(key, 12)
    enc = [layer(keys[i], enc_dims[i], enc_dims[i + 1]) for i in range(6)]
    dec = [layer(keys[6 + i], dec_dims[i], dec_dims[i + 1]) for i in range(6)]
    return enc, dec


@jax.jit
def fcae_forward(x, params):
    """x: (B, C, L) float32. Returns (out (B, C, L), z (B, LATENT_DIM))."""
    B, C, L = x.shape
    in_flat = C * L
    ic_dim = L
    x_flat = x.reshape(B, in_flat)

    act_dtype = _act_dtype()

    enc_dims = [(in_flat, 256), (256, 256), (256, 256), (256, 128),
                (128, 128), (128, LATENT_DIM)]
    dec_dims = [(LATENT_DIM + ic_dim, 128), (128, 128), (128, 256),
                (256, 256), (256, 256), (256, in_flat)]

    # --- pack 13 weights / 12 biases into two zero-padded slabs --------------
    enc, dec = params
    wd0, bd0 = dec[0]
    weights = ([w for w, _ in enc]
               + [wd0[:LATENT_DIM], wd0[LATENT_DIM:]]
               + [w for w, _ in dec[1:]])
    biases = [b for _, b in enc] + [bd0] + [b for _, b in dec[1:]]

    Din = _round_up(max(max(w.shape[0] for w in weights), 16), 16)
    Dout = _round_up(max(w.shape[1] for w in weights), 128)

    w_slab = jnp.stack([
        jnp.pad(w.astype(jnp.bfloat16),
                ((0, Din - w.shape[0]), (0, Dout - w.shape[1])))
        for w in weights])                                  # (13, Din, Dout) bf16
    b_slab = jnp.stack([
        jnp.pad(b.astype(act_dtype), (0, Dout - b.shape[0]))
        for b in biases])                                   # (12, Dout)

    # --- batch tiling: few fat steps, weights resident across the grid -------
    Bt, B_pad = _choose_tiling(B)
    if B_pad != B:
        x_flat = jnp.pad(x_flat, ((0, B_pad - B), (0, 0)))
    grid = (B_pad // Bt,)

    # --- packed lane-dense output: [ out (in_flat) | z (latent) | pad ] ------
    P = _round_up(in_flat + LATENT_DIM, 128)
    out_pad = P - in_flat - LATENT_DIM

    kernel = functools.partial(
        fcae_kernel,
        enc_dims=tuple(enc_dims), dec_dims=tuple(dec_dims),
        ic_dim=ic_dim, latent=LATENT_DIM, out_pad=out_pad, act_dtype=act_dtype)

    in_specs = [
        pl.BlockSpec((Bt, in_flat), lambda i: (i, 0)),
        pl.BlockSpec(w_slab.shape, lambda i: (0, 0, 0)),    # DMA'd once, resident
        pl.BlockSpec(b_slab.shape, lambda i: (0, 0)),       # DMA'd once, resident
    ]
    out_spec = pl.BlockSpec((Bt, P), lambda i: (i, 0))

    flops = 2 * B_pad * (sum(a * b for a, b in enc_dims)
                         + sum(a * b for a, b in dec_dims))
    bytes_accessed = (B_pad * in_flat * 4 + B_pad * P * 4
                      + w_slab.size * 2
                      + b_slab.size * b_slab.dtype.itemsize)

    packed = pl.pallas_call(
        kernel,
        out_shape=jax.ShapeDtypeStruct((B_pad, P), jnp.float32),
        grid=grid,
        in_specs=in_specs,
        out_specs=out_spec,
        compiler_params=pltpu.CompilerParams(
            dimension_semantics=("parallel",)),   # 2-TC sharding on v7x
        cost_estimate=pl.CostEstimate(
            flops=int(flops), transcendentals=0,
            bytes_accessed=int(bytes_accessed)),
    )(x_flat, w_slab, b_slab)

    out_flat = packed[:B, :in_flat]
    z = packed[:B, in_flat:in_flat + LATENT_DIM]
    return out_flat.reshape(B, C, L), z


def _reference_forward(x, params):
    """Pure-JAX f32 reference for a sanity check."""
    B, C, L = x.shape
    enc, dec = params
    h = x.reshape(B, C * L)
    for i, (w, b) in enumerate(enc):
        h = h @ w + b
        if i < 5:
            h = jnp.maximum(h, 0.0)
    z = h
    d = jnp.concatenate([z, x[:, 0, :]], axis=1)
    for i, (w, b) in enumerate(dec):
        d = d @ w + b
        if i < 5:
            d = jnp.maximum(d, 0.0)
    return d.reshape(B, C, L), z


if __name__ == "__main__":
    # input_dim = (C, L) => self.input_dim = C*L = 64, ic_dim = L = 16
    B, C, L = 2, 4, 16

    key = jax.random.PRNGKey(0)
    k_x, k_p = jax.random.split(key)
    x = jax.random.normal(k_x, (B, C, L), dtype=jnp.float32)
    params = init_params(k_p, in_flat=C * L, ic_dim=L)

    out, z = fcae_forward(x, params)
    jax.block_until_ready((out, z))

    assert out.shape == (B, C, L), out.shape
    assert z.shape == (B, LATENT_DIM), z.shape

    # loose tolerance: kernel uses bf16 matmul operands (and, on v6e/v7x, a bf16
    # inter-layer chain) with f32 reference
    out_ref, z_ref = _reference_forward(x, params)
    assert jnp.allclose(out, out_ref, atol=5e-2, rtol=5e-2), (
        float(jnp.max(jnp.abs(out - out_ref))))
    assert jnp.allclose(z, z_ref, atol=5e-2, rtol=5e-2), (
        float(jnp.max(jnp.abs(z - z_ref))))

    print("KERNEL_OK")
</pallas_src>

<mosaic_0001>
module attributes {stable_mosaic.version = 11 : i64} {
  func.func @fcae_kernel(%arg0: i32, %arg1: memref<8x64xf32, #tpu.memory_space<vmem>>, %arg2: memref<13x256x256xbf16, #tpu.memory_space<vmem>>, %arg3: memref<12x256xf32, #tpu.memory_space<vmem>>, %arg4: memref<8x128xf32, #tpu.memory_space<vmem>>) attributes {dimension_semantics = [#tpu.dimension_semantics<parallel>], iteration_bounds = array<i64: 1>, scalar_prefetch = 0 : i64, scratch_operands = 0 : i64, tpu.core_type = #tpu.core_type<tc>, window_params = [{transform_indices = @transform_0, window_bounds = array<i64: 8, 64>}, {pipeline_mode = #tpu.pipeline_mode<synchronous>, transform_indices = @transform_1, window_bounds = array<i64: 13, 256, 256>}, {pipeline_mode = #tpu.pipeline_mode<synchronous>, transform_indices = @transform_2, window_bounds = array<i64: 12, 256>}, {transform_indices = @transform_3, window_bounds = array<i64: 8, 128>}]} {
    %c0 = arith.constant 0 : index
    %c0_0 = arith.constant 0 : index
    %0 = vector.load %arg1[%c0, %c0_0] : memref<8x64xf32, #tpu.memory_space<vmem>>, vector<8x64xf32>
    %1 = vector.extract_strided_slice %0 {offsets = [0, 0], sizes = [8, 16], strides = [1, 1]} : vector<8x64xf32> to vector<8x16xf32>
    %c0_1 = arith.constant 0 : index
    %c0_2 = arith.constant 0 : index
    %c0_3 = arith.constant 0 : index
    %2 = vector.load %arg2[%c0_1, %c0_2, %c0_3] : memref<13x256x256xbf16, #tpu.memory_space<vmem>>, vector<1x64x256xbf16>
    %3 = vector.shape_cast %2 : vector<1x64x256xbf16> to vector<64x256xbf16>
    %c0_4 = arith.constant 0 : index
    %c0_5 = arith.constant 0 : index
    %4 = vector.load %arg3[%c0_4, %c0_5] : memref<12x256xf32, #tpu.memory_space<vmem>>, vector<1x256xf32>
    %5 = arith.truncf %0 : vector<8x64xf32> to vector<8x64xbf16>
    %cst = arith.constant dense<0.000000e+00> : vector<8x256xf32>
    %6 = tpu.matmul %5, %3, %cst {dimension_numbers = #tpu.dot_dimension_numbers<[1], [0], [0], [1], [0, 0, 1, 1], [], []>} : vector<8x64xbf16>, vector<64x256xbf16>, vector<8x256xf32> -> vector<8x256xf32>
    %7 = vector.broadcast %4 : vector<1x256xf32> to vector<8x256xf32>
    %8 = arith.addf %6, %7 : vector<8x256xf32>
    %cst_6 = arith.constant 0.000000e+00 : f32
    %9 = vector.broadcast %cst_6 : f32 to vector<8x256xf32>
    %10 = arith.maximumf %8, %9 : vector<8x256xf32>
    %c1 = arith.constant 1 : index
    %c0_7 = arith.constant 0 : index
    %c0_8 = arith.constant 0 : index
    %11 = vector.load %arg2[%c1, %c0_7, %c0_8] : memref<13x256x256xbf16, #tpu.memory_space<vmem>>, vector<1x256x256xbf16>
    %12 = vector.shape_cast %11 : vector<1x256x256xbf16> to vector<256x256xbf16>
    %c1_9 = arith.constant 1 : index
    %c0_10 = arith.constant 0 : index
    %13 = vector.load %arg3[%c1_9, %c0_10] : memref<12x256xf32, #tpu.memory_space<vmem>>, vector<1x256xf32>
    %14 = arith.truncf %10 : vector<8x256xf32> to vector<8x256xbf16>
    %cst_11 = arith.constant dense<0.000000e+00> : vector<8x256xf32>
    %15 = tpu.matmul %14, %12, %cst_11 {dimension_numbers = #tpu.dot_dimension_numbers<[1], [0], [0], [1], [0, 0, 1, 1], [], []>} : vector<8x256xbf16>, vector<256x256xbf16>, vector<8x256xf32> -> vector<8x256xf32>
    %16 = vector.broadcast %13 : vector<1x256xf32> to vector<8x256xf32>
    %17 = arith.addf %15, %16 : vector<8x256xf32>
    %cst_12 = arith.constant 0.000000e+00 : f32
    %18 = vector.broadcast %cst_12 : f32 to vector<8x256xf32>
    %19 = arith.maximumf %17, %18 : vector<8x256xf32>
    %c2 = arith.constant 2 : index
    %c0_13 = arith.constant 0 : index
    %c0_14 = arith.constant 0 : index
    %20 = vector.load %arg2[%c2, %c0_13, %c0_14] : memref<13x256x256xbf16, #tpu.memory_space<vmem>>, vector<1x256x256xbf16>
    %21 = vector.shape_cast %20 : vector<1x256x256xbf16> to vector<256x256xbf16>
    %c2_15 = arith.constant 2 : index
    %c0_16 = arith.constant 0 : index
    %22 = vector.load %arg3[%c2_15, %c0_16] : memref<12x256xf32, #tpu.memory_space<vmem>>, vector<1x256xf32>
    %23 = arith.truncf %19 : vector<8x256xf32> to vector<8x256xbf16>
    %cst_17 = arith.constant dense<0.000000e+00> : vector<8x256xf32>
    %24 = tpu.matmul %23, %21, %cst_17 {dimension_numbers = #tpu.dot_dimension_numbers<[1], [0], [0], [1], [0, 0, 1, 1], [], []>} : vector<8x256xbf16>, vector<256x256xbf16>, vector<8x256xf32> -> vector<8x256xf32>
    %25 = vector.broadcast %22 : vector<1x256xf32> to vector<8x256xf32>
    %26 = arith.addf %24, %25 : vector<8x256xf32>
    %cst_18 = arith.constant 0.000000e+00 : f32
    %27 = vector.broadcast %cst_18 : f32 to vector<8x256xf32>
    %28 = arith.maximumf %26, %27 : vector<8x256xf32>
    %c3 = arith.constant 3 : index
    %c0_19 = arith.constant 0 : index
    %c0_20 = arith.constant 0 : index
    %29 = vector.load %arg2[%c3, %c0_19, %c0_20] : memref<13x256x256xbf16, #tpu.memory_space<vmem>>, vector<1x256x128xbf16>
    %30 = vector.shape_cast %29 : vector<1x256x128xbf16> to vector<256x128xbf16>
    %c3_21 = arith.constant 3 : index
    %c0_22 = arith.constant 0 : index
    %31 = vector.load %arg3[%c3_21, %c0_22] : memref<12x256xf32, #tpu.memory_space<vmem>>, vector<1x128xf32>
    %32 = arith.truncf %28 : vector<8x256xf32> to vector<8x256xbf16>
    %cst_23 = arith.constant dense<0.000000e+00> : vector<8x128xf32>
    %33 = tpu.matmul %32, %30, %cst_23 {dimension_numbers = #tpu.dot_dimension_numbers<[1], [0], [0], [1], [0, 0, 1, 1], [], []>} : vector<8x256xbf16>, vector<256x128xbf16>, vector<8x128xf32> -> vector<8x128xf32>
    %34 = vector.broadcast %31 : vector<1x128xf32> to vector<8x128xf32>
    %35 = arith.addf %33, %34 : vector<8x128xf32>
    %cst_24 = arith.constant 0.000000e+00 : f32
    %36 = vector.broadcast %cst_24 : f32 to vector<8x128xf32>
    %37 = arith.maximumf %35, %36 : vector<8x128xf32>
    %c4 = arith.constant 4 : index
    %c0_25 = arith.constant 0 : index
    %c0_26 = arith.constant 0 : index
    %38 = vector.load %arg2[%c4, %c0_25, %c0_26] : memref<13x256x256xbf16, #tpu.memory_space<vmem>>, vector<1x128x128xbf16>
    %39 = vector.shape_cast %38 : vector<1x128x128xbf16> to vector<128x128xbf16>
    %c4_27 = arith.constant 4 : index
    %c0_28 = arith.constant 0 : index
    %40 = vector.load %arg3[%c4_27, %c0_28] : memref<12x256xf32, #tpu.memory_space<vmem>>, vector<1x128xf32>
    %41 = arith.truncf %37 : vector<8x128xf32> to vector<8x128xbf16>
    %cst_29 = arith.constant dense<0.000000e+00> : vector<8x128xf32>
    %42 = tpu.matmul %41, %39, %cst_29 {dimension_numbers = #tpu.dot_dimension_numbers<[1], [0], [0], [1], [0, 0, 1, 1], [], []>} : vector<8x128xbf16>, vector<128x128xbf16>, vector<8x128xf32> -> vector<8x128xf32>
    %43 = vector.broadcast %40 : vector<1x128xf32> to vector<8x128xf32>
    %44 = arith.addf %42, %43 : vector<8x128xf32>
    %cst_30 = arith.constant 0.000000e+00 : f32
    %45 = vector.broadcast %cst_30 : f32 to vector<8x128xf32>
    %46 = arith.maximumf %44, %45 : vector<8x128xf32>
    %c5 = arith.constant 5 : index
    %c0_31 = arith.constant 0 : index
    %c0_32 = arith.constant 0 : index
    %47 = vector.load %arg2[%c5, %c0_31, %c0_32] : memref<13x256x256xbf16, #tpu.memory_space<vmem>>, vector<1x128x32xbf16>
    %48 = vector.shape_cast %47 : vector<1x128x32xbf16> to vector<128x32xbf16>
    %c5_33 = arith.constant 5 : index
    %c0_34 = arith.constant 0 : index
    %49 = vector.load %arg3[%c5_33, %c0_34] : memref<12x256xf32, #tpu.memory_space<vmem>>, vector<1x32xf32>
    %50 = arith.truncf %46 : vector<8x128xf32> to vector<8x128xbf16>
    %cst_35 = arith.constant dense<0.000000e+00> : vector<8x32xf32>
    %51 = tpu.matmul %50, %48, %cst_35 {dimension_numbers = #tpu.dot_dimension_numbers<[1], [0], [0], [1], [0, 0, 1, 1], [], []>} : vector<8x128xbf16>, vector<128x32xbf16>, vector<8x32xf32> -> vector<8x32xf32>
    %52 = vector.broadcast %49 : vector<1x32xf32> to vector<8x32xf32>
    %53 = arith.addf %51, %52 : vector<8x32xf32>
    %c6 = arith.constant 6 : index
    %c0_36 = arith.constant 0 : index
    %c0_37 = arith.constant 0 : index
    %54 = vector.load %arg2[%c6, %c0_36, %c0_37] : memref<13x256x256xbf16, #tpu.memory_space<vmem>>, vector<1x32x128xbf16>
    %55 = vector.shape_cast %54 : vector<1x32x128xbf16> to vector<32x128xbf16>
    %c7 = arith.constant 7 : index
    %c0_38 = arith.constant 0 : index
    %c0_39 = arith.constant 0 : index
    %56 = vector.load %arg2[%c7, %c0_38, %c0_39] : memref<13x256x256xbf16, #tpu.memory_space<vmem>>, vector<1x16x128xbf16>
    %57 = vector.shape_cast %56 : vector<1x16x128xbf16> to vector<16x128xbf16>
    %58 = arith.truncf %53 : vector<8x32xf32> to vector<8x32xbf16>
    %cst_40 = arith.constant dense<0.000000e+00> : vector<8x128xf32>
    %59 = tpu.matmul %58, %55, %cst_40 {dimension_numbers = #tpu.dot_dimension_numbers<[1], [0], [0], [1], [0, 0, 1, 1], [], []>} : vector<8x32xbf16>, vector<32x128xbf16>, vector<8x128xf32> -> vector<8x128xf32>
    %60 = arith.truncf %1 : vector<8x16xf32> to vector<8x16xbf16>
    %cst_41 = arith.constant dense<0.000000e+00> : vector<8x128xf32>
    %61 = tpu.matmul %60, %57, %cst_41 {dimension_numbers = #tpu.dot_dimension_numbers<[1], [0], [0], [1], [0, 0, 1, 1], [], []>} : vector<8x16xbf16>, vector<16x128xbf16>, vector<8x128xf32> -> vector<8x128xf32>
    %62 = arith.addf %59, %61 : vector<8x128xf32>
    %c6_42 = arith.constant 6 : index
    %c0_43 = arith.constant 0 : index
    %63 = vector.load %arg3[%c6_42, %c0_43] : memref<12x256xf32, #tpu.memory_space<vmem>>, vector<1x128xf32>
    %64 = vector.broadcast %63 : vector<1x128xf32> to vector<8x128xf32>
    %65 = arith.addf %62, %64 : vector<8x128xf32>
    %cst_44 = arith.constant 0.000000e+00 : f32
    %66 = vector.broadcast %cst_44 : f32 to vector<8x128xf32>
    %67 = arith.maximumf %65, %66 : vector<8x128xf32>
    %c8 = arith.constant 8 : index
    %c0_45 = arith.constant 0 : index
    %c0_46 = arith.constant 0 : index
    %68 = vector.load %arg2[%c8, %c0_45, %c0_46] : memref<13x256x256xbf16, #tpu.memory_space<vmem>>, vector<1x128x128xbf16>
    %69 = vector.shape_cast %68 : vector<1x128x128xbf16> to vector<128x128xbf16>
    %c7_47 = arith.constant 7 : index
    %c0_48 = arith.constant 0 : index
    %70 = vector.load %arg3[%c7_47, %c0_48] : memref<12x256xf32, #tpu.memory_space<vmem>>, vector<1x128xf32>
    %71 = arith.truncf %67 : vector<8x128xf32> to vector<8x128xbf16>
    %cst_49 = arith.constant dense<0.000000e+00> : vector<8x128xf32>
    %72 = tpu.matmul %71, %69, %cst_49 {dimension_numbers = #tpu.dot_dimension_numbers<[1], [0], [0], [1], [0, 0, 1, 1], [], []>} : vector<8x128xbf16>, vector<128x128xbf16>, vector<8x128xf32> -> vector<8x128xf32>
    %73 = vector.broadcast %70 : vector<1x128xf32> to vector<8x128xf32>
    %74 = arith.addf %72, %73 : vector<8x128xf32>
    %cst_50 = arith.constant 0.000000e+00 : f32
    %75 = vector.broadcast %cst_50 : f32 to vector<8x128xf32>
    %76 = arith.maximumf %74, %75 : vector<8x128xf32>
    %c9 = arith.constant 9 : index
    %c0_51 = arith.constant 0 : index
    %c0_52 = arith.constant 0 : index
    %77 = vector.load %arg2[%c9, %c0_51, %c0_52] : memref<13x256x256xbf16, #tpu.memory_space<vmem>>, vector<1x128x256xbf16>
    %78 = vector.shape_cast %77 : vector<1x128x256xbf16> to vector<128x256xbf16>
    %c8_53 = arith.constant 8 : index
    %c0_54 = arith.constant 0 : index
    %79 = vector.load %arg3[%c8_53, %c0_54] : memref<12x256xf32, #tpu.memory_space<vmem>>, vector<1x256xf32>
    %80 = arith.truncf %76 : vector<8x128xf32> to vector<8x128xbf16>
    %cst_55 = arith.constant dense<0.000000e+00> : vector<8x256xf32>
    %81 = tpu.matmul %80, %78, %cst_55 {dimension_numbers = #tpu.dot_dimension_numbers<[1], [0], [0], [1], [0, 0, 1, 1], [], []>} : vector<8x128xbf16>, vector<128x256xbf16>, vector<8x256xf32> -> vector<8x256xf32>
    %82 = vector.broadcast %79 : vector<1x256xf32> to vector<8x256xf32>
    %83 = arith.addf %81, %82 : vector<8x256xf32>
    %cst_56 = arith.constant 0.000000e+00 : f32
    %84 = vector.broadcast %cst_56 : f32 to vector<8x256xf32>
    %85 = arith.maximumf %83, %84 : vector<8x256xf32>
    %c10 = arith.constant 10 : index
    %c0_57 = arith.constant 0 : index
    %c0_58 = arith.constant 0 : index
    %86 = vector.load %arg2[%c10, %c0_57, %c0_58] : memref<13x256x256xbf16, #tpu.memory_space<vmem>>, vector<1x256x256xbf16>
    %87 = vector.shape_cast %86 : vector<1x256x256xbf16> to vector<256x256xbf16>
    %c9_59 = arith.constant 9 : index
    %c0_60 = arith.constant 0 : index
    %88 = vector.load %arg3[%c9_59, %c0_60] : memref<12x256xf32, #tpu.memory_space<vmem>>, vector<1x256xf32>
    %89 = arith.truncf %85 : vector<8x256xf32> to vector<8x256xbf16>
    %cst_61 = arith.constant dense<0.000000e+00> : vector<8x256xf32>
    %90 = tpu.matmul %89, %87, %cst_61 {dimension_numbers = #tpu.dot_dimension_numbers<[1], [0], [0], [1], [0, 0, 1, 1], [], []>} : vector<8x256xbf16>, vector<256x256xbf16>, vector<8x256xf32> -> vector<8x256xf32>
    %91 = vector.broadcast %88 : vector<1x256xf32> to vector<8x256xf32>
    %92 = arith.addf %90, %91 : vector<8x256xf32>
    %cst_62 = arith.constant 0.000000e+00 : f32
    %93 = vector.broadcast %cst_62 : f32 to vector<8x256xf32>
    %94 = arith.maximumf %92, %93 : vector<8x256xf32>
    %c11 = arith.constant 11 : index
    %c0_63 = arith.constant 0 : index
    %c0_64 = arith.constant 0 : index
    %95 = vector.load %arg2[%c11, %c0_63, %c0_64] : memref<13x256x256xbf16, #tpu.memory_space<vmem>>, vector<1x256x256xbf16>
    %96 = vector.shape_cast %95 : vector<1x256x256xbf16> to vector<256x256xbf16>
    %c10_65 = arith.constant 10 : index
    %c0_66 = arith.constant 0 : index
    %97 = vector.load %arg3[%c10_65, %c0_66] : memref<12x256xf32, #tpu.memory_space<vmem>>, vector<1x256xf32>
    %98 = arith.truncf %94 : vector<8x256xf32> to vector<8x256xbf16>
    %cst_67 = arith.constant dense<0.000000e+00> : vector<8x256xf32>
    %99 = tpu.matmul %98, %96, %cst_67 {dimension_numbers = #tpu.dot_dimension_numbers<[1], [0], [0], [1], [0, 0, 1, 1], [], []>} : vector<8x256xbf16>, vector<256x256xbf16>, vector<8x256xf32> -> vector<8x256xf32>
    %100 = vector.broadcast %97 : vector<1x256xf32> to vector<8x256xf32>
    %101 = arith.addf %99, %100 : vector<8x256xf32>
    %cst_68 = arith.constant 0.000000e+00 : f32
    %102 = vector.broadcast %cst_68 : f32 to vector<8x256xf32>
    %103 = arith.maximumf %101, %102 : vector<8x256xf32>
    %c12 = arith.constant 12 : index
    %c0_69 = arith.constant 0 : index
    %c0_70 = arith.constant 0 : index
    %104 = vector.load %arg2[%c12, %c0_69, %c0_70] : memref<13x256x256xbf16, #tpu.memory_space<vmem>>, vector<1x256x64xbf16>
    %105 = vector.shape_cast %104 : vector<1x256x64xbf16> to vector<256x64xbf16>
    %c11_71 = arith.constant 11 : index
    %c0_72 = arith.constant 0 : index
    %106 = vector.load %arg3[%c11_71, %c0_72] : memref<12x256xf32, #tpu.memory_space<vmem>>, vector<1x64xf32>
    %107 = arith.truncf %103 : vector<8x256xf32> to vector<8x256xbf16>
    %cst_73 = arith.constant dense<0.000000e+00> : vector<8x64xf32>
    %108 = tpu.matmul %107, %105, %cst_73 {dimension_numbers = #tpu.dot_dimension_numbers<[1], [0], [0], [1], [0, 0, 1, 1], [], []>} : vector<8x256xbf16>, vector<256x64xbf16>, vector<8x64xf32> -> vector<8x64xf32>
    %109 = vector.broadcast %106 : vector<1x64xf32> to vector<8x64xf32>
    %110 = arith.addf %108, %109 : vector<8x64xf32>
    %c0_74 = arith.constant 0 : index
    %c0_75 = arith.constant 0 : index
    %111 = vector.load %arg4[%c0_74, %c0_75] : memref<8x128xf32, #tpu.memory_space<vmem>>, vector<8x64xf32>
    tpu.vector_store %arg4[%c0_74, %c0_75], %110 {strides = array<i32>} : memref<8x128xf32, #tpu.memory_space<vmem>>, vector<8x64xf32>,
    %c0_76 = arith.constant 0 : index
    %c64 = arith.constant 64 : index
    %112 = vector.load %arg4[%c0_76, %c64] : memref<8x128xf32, #tpu.memory_space<vmem>>, vector<8x32xf32>
    tpu.vector_store %arg4[%c0_76, %c64], %53 {strides = array<i32>} : memref<8x128xf32, #tpu.memory_space<vmem>>, vector<8x32xf32>,
    %cst_77 = arith.constant 0.000000e+00 : f32
    %113 = vector.broadcast %cst_77 : f32 to vector<8x32xf32>
    %c0_78 = arith.constant 0 : index
    %c96 = arith.constant 96 : index
    %114 = vector.load %arg4[%c0_78, %c96] : memref<8x128xf32, #tpu.memory_space<vmem>>, vector<8x32xf32>
    tpu.vector_store %arg4[%c0_78, %c96], %113 {strides = array<i32>} : memref<8x128xf32, #tpu.memory_space<vmem>>, vector<8x32xf32>,
    return
  }
  func.func @transform_0(%arg0: i32) -> (i32, i32) {
    %c0_i32 = arith.constant 0 : i32
    %c0_i32_0 = arith.constant 0 : i32
    return %arg0, %c0_i32 : i32, i32
  }
  func.func @transform_1(%arg0: i32) -> (i32, i32, i32) {
    %c0_i32 = arith.constant 0 : i32
    %c0_i32_0 = arith.constant 0 : i32
    %c0_i32_1 = arith.constant 0 : i32
    %c0_i32_2 = arith.constant 0 : i32
    return %c0_i32, %c0_i32_0, %c0_i32_1 : i32, i32, i32
  }
  func.func @transform_2(%arg0: i32) -> (i32, i32) {
    %c0_i32 = arith.constant 0 : i32
    %c0_i32_0 = arith.constant 0 : i32
    %c0_i32_1 = arith.constant 0 : i32
    return %c0_i32, %c0_i32_0 : i32, i32
  }
  func.func @transform_3(%arg0: i32) -> (i32, i32) {
    %c0_i32 = arith.constant 0 : i32
    %c0_i32_0 = arith.constant 0 : i32
    return %arg0, %c0_i32 : i32, i32
  }
}

</mosaic_0001>

<bundles_post_ra>
// kernel: fcae_forward.1
= control target key start
LH: loop header
LB: loop body
LE: loop exit
PB: predicated region body
PF: predicated region fallthrough
CT: control target
= control target key end

     0   :  { %v3002_v1 = vmov 0   ;;  %vm77_vm0 = vcmask 523264   ;;  %vm3004_vm1 = vmmov 0   ;;  %vm1029_vm2 = vcmask 130048   ;;  %s3005_s18 = smov 64   ;;  %s3772_s1 = inlined_call_operand.vmem [shape: bf16[13,256,256], index: 1, kind: input, shape index: {}]   ;;  %s3773_s0 = inlined_call_operand.vmem [shape: f32[8,64], index: 0, kind: input, shape index: {}]   ;;  %s3774_s2 = inlined_call_operand.vmem [shape: f32[12,256], index: 2, kind: input, shape index: {}]   ;;  %s3775_s3 = inlined_call_operand.vmem [shape: f32[8,128], index: 3, kind: output, shape index: {}]  }
   0x1   :  { %v2715_v0 = vld [vmem:[%s3772_s1 + $0x4] ss:$8 sps:$4 sm:$0xff]   ;;  %113 = vmatprep.mubr.bf16.mxu1 %v3002_v1  ;;  %v2717_v2 = vld [vmem:[%s3772_s1] ss:$8 sps:$4 sm:$0xff]   ;;  %v2718_v3 = vld [vmem:[%s3772_s1 + $0x14] ss:$8 sps:$4 sm:$0xff]  }
   0x2   :  { %81 = vmatprep.subr.bf16.mxu1 %v2715_v0  ;;  %v2720_v4 = vld [vmem:[%s3772_s1 + $0x10] ss:$8 sps:$4 sm:$0xff]   ;;  %v2721_v5 = vld [vmem:[%s3772_s1 + $0x24] ss:$8 sps:$4 sm:$0xff]   ;;  %v2723_v6 = vld [vmem:[%s3772_s1 + $0x20] ss:$8 sps:$4 sm:$0xff]  }
   0x3   :  { %82 = vmatpush1.bf16.msra.mxu1 %v2717_v2  ;;  %v2724_v7 = vld [vmem:[%s3772_s1 + $0x34] ss:$8 sps:$4 sm:$0xff]   ;;  %v2726_v8 = vld [vmem:[%s3772_s1 + $0x30] ss:$8 sps:$4 sm:$0xff]   ;;  %v15_v9 = vld [vmem:[%s3773_s0] sm:$0xff]  ;;  %vm1084_vm3 = vcmask 261120  }
   0x4   :  { %83 = vmatprep.subr.bf16.mxu1 %v2718_v3  ;;  %v2729_v10 = vld [vmem:[%s3772_s1 + $0x104] ss:$8 sps:$4 sm:$0xff]   ;;  %v3057_v11 = vpack.c.bf16 %v15_v9, %v15_v9  ;;  %v2727_v12 = vld [vmem:[%s3772_s1 + $0x100] ss:$8 sps:$4 sm:$0xff]   ;;  %v2732_v13 = vld [vmem:[%s3772_s1 + $0x114] ss:$8 sps:$4 sm:$0xff]  }
   0x5   :  { %v2730_v14 = vld [vmem:[%s3772_s1 + $0x110] ss:$8 sps:$4 sm:$0xff]   ;;  %v2735_v15 = vld [vmem:[%s3772_s1 + $0x124] ss:$8 sps:$4 sm:$0xff]   ;;  %v2733_v16 = vld [vmem:[%s3772_s1 + $0x120] ss:$8 sps:$4 sm:$0xff]  }
   0x6   :  { %v2738_v17 = vld [vmem:[%s3772_s1 + $0x134] ss:$8 sps:$4 sm:$0xff]   ;;  %v2736_v18 = vld [vmem:[%s3772_s1 + $0x130] ss:$8 sps:$4 sm:$0xff]   ;;  %v2741_v19 = vld [vmem:[%s3772_s1 + $0x144] ss:$8 sps:$4 sm:$0xff]  }
   0x7   :  { %84 = vmatpush1.bf16.msra.mxu1 %v2720_v4  ;;  %v2739_v20 = vld [vmem:[%s3772_s1 + $0x140] ss:$8 sps:$4 sm:$0xff]   ;;  %v2744_v21 = vld [vmem:[%s3772_s1 + $0x154] ss:$8 sps:$4 sm:$0xff]   ;;  %v2742_v22 = vld [vmem:[%s3772_s1 + $0x150] ss:$8 sps:$4 sm:$0xff]  }
   0x8   :  { %85 = vmatprep.subr.bf16.mxu1 %v2721_v5  ;;  %v2747_v23 = vld [vmem:[%s3772_s1 + $0x164] ss:$8 sps:$4 sm:$0xff]   ;;  %v2745_v24 = vld [vmem:[%s3772_s1 + $0x160] ss:$8 sps:$4 sm:$0xff]   ;;  %v2750_v25 = vld [vmem:[%s3772_s1 + $0x174] ss:$8 sps:$4 sm:$0xff]  }
   0x9   :  { %v2748_v26 = vld [vmem:[%s3772_s1 + $0x170] ss:$8 sps:$4 sm:$0xff]   ;;  %v2753_v27 = vld [vmem:[%s3772_s1 + $0x184] ss:$8 sps:$4 sm:$0xff]   ;;  %v2751_v28 = vld [vmem:[%s3772_s1 + $0x180] ss:$8 sps:$4 sm:$0xff]  }
   0xa   :  { %v2756_v29 = vld [vmem:[%s3772_s1 + $0x194] ss:$8 sps:$4 sm:$0xff]   ;;  %v2754_v30 = vld [vmem:[%s3772_s1 + $0x190] ss:$8 sps:$4 sm:$0xff]   ;;  %v2759_v31 = vld [vmem:[%s3772_s1 + $0x1a4] ss:$8 sps:$4 sm:$0xff]  }
   0xb   :  { %86 = vmatpush1.bf16.msra.mxu1 %v2723_v6  ;;  %v2757_v32 = vld [vmem:[%s3772_s1 + $0x1a0] ss:$8 sps:$4 sm:$0xff]   ;;  %v2762_v33 = vld [vmem:[%s3772_s1 + $0x1b4] ss:$8 sps:$4 sm:$0xff]   ;;  %v2760_v34 = vld [vmem:[%s3772_s1 + $0x1b0] ss:$8 sps:$4 sm:$0xff]  }
   0xc   :  { %87 = vmatprep.subr.bf16.mxu1 %v2724_v7  ;;  %v2765_v35 = vld [vmem:[%s3772_s1 + $0x1c4] ss:$8 sps:$4 sm:$0xff]   ;;  %v2763_v36 = vld [vmem:[%s3772_s1 + $0x1c0] ss:$8 sps:$4 sm:$0xff]   ;;  %v2768_v37 = vld [vmem:[%s3772_s1 + $0x1d4] ss:$8 sps:$4 sm:$0xff]  }
   0xd   :  { %v2766_v38 = vld [vmem:[%s3772_s1 + $0x1d0] ss:$8 sps:$4 sm:$0xff]   ;;  %v2771_v39 = vld [vmem:[%s3772_s1 + $0x1e4] ss:$8 sps:$4 sm:$0xff]   ;;  %v2769_v40 = vld [vmem:[%s3772_s1 + $0x1e0] ss:$8 sps:$4 sm:$0xff]  }
   0xe   :  { %v2774_v41 = vld [vmem:[%s3772_s1 + $0x1f4] ss:$8 sps:$4 sm:$0xff]   ;;  %v2772_v42 = vld [vmem:[%s3772_s1 + $0x1f0] ss:$8 sps:$4 sm:$0xff]   ;;  %v2775_v43 = vld [vmem:[%s3772_s1 + $0x204] ss:$8 sps:$4 sm:$0xff]  }
   0xf   :  { %88 = vmatpush1.bf16.msra.mxu1 %v2726_v8  ;;  %v2777_v44 = vld [vmem:[%s3772_s1 + $0x200] ss:$8 sps:$4 sm:$0xff]   ;;  %v2778_v45 = vld [vmem:[%s3772_s1 + $0x214] ss:$8 sps:$4 sm:$0xff]   ;;  %583 = vmatprep.subr.bf16.mxu0 %v2775_v43  ;;  %v2780_v46 = vld [vmem:[%s3772_s1 + $0x210] ss:$8 sps:$4 sm:$0xff]   ;;  %v27_v8 = vlaneseq }
  0x10   :  { %332 = vmatprep.subr.bf16.mxu1 %v2729_v10  ;;  %584 = vmatpush1.bf16.msra.mxu0 %v2777_v44  ;;  %v2781_v47 = vld [vmem:[%s3772_s1 + $0x224] ss:$8 sps:$4 sm:$0xff]   ;;  %v2783_v48 = vld [vmem:[%s3772_s1 + $0x220] ss:$8 sps:$4 sm:$0xff]   ;;  %v2784_v49 = vld [vmem:[%s3772_s1 + $0x234] ss:$8 sps:$4 sm:$0xff]  }
  0x11   :  { %585 = vmatprep.subr.bf16.mxu0 %v2778_v45  ;;  %v2786_v50 = vld [vmem:[%s3772_s1 + $0x230] ss:$8 sps:$4 sm:$0xff]   ;;  %v2787_v51 = vld [vmem:[%s3772_s1 + $0x244] ss:$8 sps:$4 sm:$0xff]   ;;  %v2789_v52 = vld [vmem:[%s3772_s1 + $0x240] ss:$8 sps:$4 sm:$0xff]  }
  0x12   :  { %2088 = vmatmul.mubr.msk.bf16.vlgmr.msra.gmra.mrb[0].mxu1 %vm77_vm0, %v3057_v11  ;;  %v2790_v53 = vld [vmem:[%s3772_s1 + $0x254] ss:$8 sps:$4 sm:$0xff]   ;;  %v2792_v54 = vld [vmem:[%s3772_s1 + $0x250] ss:$8 sps:$4 sm:$0xff]   ;;  %v2793_v55 = vld [vmem:[%s3772_s1 + $0x264] ss:$8 sps:$4 sm:$0xff]  }
  0x13   :  { %333 = vmatpush1.bf16.msra.mxu1 %v2727_v12  ;;  %v2795_v56 = vld [vmem:[%s3772_s1 + $0x260] ss:$8 sps:$4 sm:$0xff]   ;;  %v2796_v57 = vld [vmem:[%s3772_s1 + $0x274] ss:$8 sps:$4 sm:$0xff]   ;;  %v2798_v58 = vld [vmem:[%s3772_s1 + $0x270] ss:$8 sps:$4 sm:$0xff]  }
  0x14   :  { %334 = vmatprep.subr.bf16.mxu1 %v2732_v13  ;;  %586 = vmatpush1.bf16.msra.mxu0 %v2780_v46  ;;  %v2799_v59 = vld [vmem:[%s3772_s1 + $0x284] ss:$8 sps:$4 sm:$0xff]   ;;  %v2801_v60 = vld [vmem:[%s3772_s1 + $0x280] ss:$8 sps:$4 sm:$0xff]   ;;  %v2802_v61 = vld [vmem:[%s3772_s1 + $0x294] ss:$8 sps:$4 sm:$0xff]  }
  0x15   :  { %587 = vmatprep.subr.bf16.mxu0 %v2781_v47  ;;  %v2804_v62 = vld [vmem:[%s3772_s1 + $0x290] ss:$8 sps:$4 sm:$0xff]   ;;  %v2805_v63 = vld [vmem:[%s3772_s1 + $0x2a4] ss:$8 sps:$4 sm:$0xff]   ;;  %v2807_v0 = vld [vmem:[%s3772_s1 + $0x2a0] ss:$8 sps:$4 sm:$0xff]  }
  0x16   :  { %v2808_v2 = vld [vmem:[%s3772_s1 + $0x2b4] ss:$8 sps:$4 sm:$0xff]   ;;  %v2810_v3 = vld [vmem:[%s3772_s1 + $0x2b0] ss:$8 sps:$4 sm:$0xff]   ;;  %v2811_v4 = vld [vmem:[%s3772_s1 + $0x2c4] ss:$8 sps:$4 sm:$0xff]  }
  0x17   :  { %335 = vmatpush1.bf16.msra.mxu1 %v2730_v14  ;;  %v2813_v5 = vld [vmem:[%s3772_s1 + $0x2c0] ss:$8 sps:$4 sm:$0xff]   ;;  %v2814_v6 = vld [vmem:[%s3772_s1 + $0x2d4] ss:$8 sps:$4 sm:$0xff]   ;;  %v2816_v7 = vld [vmem:[%s3772_s1 + $0x2d0] ss:$8 sps:$4 sm:$0xff]  }
  0x18   :  { %336 = vmatprep.subr.bf16.mxu1 %v2735_v15  ;;  %588 = vmatpush1.bf16.msra.mxu0 %v2783_v48  ;;  %v28_v9 = vshrl.u32 %v27_v8, 7  ;;  %v24_v12 = vld [vmem:[%s3774_s2] ss:$8 sm:$0x3]  ;;  %vm2072_vm4 = vcmask 785920   ;;  %vm2074_vm5 = vcmask 1048320  }
  0x19   :  { %589 = vmatprep.subr.bf16.mxu0 %v2784_v49 }
  0x1a   :  { %v3238_v10 = vsub.s32 0, %v28_v9  ;;  %v3243_v13 = vsub.s32 1, %v28_v9 }
  0x1b   :  { %337 = vmatpush1.bf16.msra.mxu1 %v2733_v16 }
  0x1c   :  { %338 = vmatprep.subr.bf16.mxu1 %v2738_v17  ;;  %590 = vmatpush1.bf16.msra.mxu0 %v2786_v50  ;;  %v30_v14 = vrot.slane %v24_v12, %v3238_v10  ;;  %v34_v15 = vrot.slane %v24_v12, %v3243_v13 }
  0x1d   :  { %591 = vmatprep.subr.bf16.mxu0 %v2787_v51 }
  0x1f   :  { %339 = vmatpush1.bf16.msra.mxu1 %v2736_v18 }
  0x20   :  { %340 = vmatprep.subr.bf16.mxu1 %v2741_v19  ;;  %592 = vmatpush1.bf16.msra.mxu0 %v2789_v52 }
  0x21   :  { %593 = vmatprep.subr.bf16.mxu0 %v2790_v53 }
  0x23   :  { %341 = vmatpush1.bf16.msra.mxu1 %v2739_v20 }
  0x24   :  { %342 = vmatprep.subr.bf16.mxu1 %v2744_v21  ;;  %594 = vmatpush1.bf16.msra.mxu0 %v2792_v54 }
  0x25   :  { %595 = vmatprep.subr.bf16.mxu0 %v2793_v55  ;;  %v2835_v55 = vld [vmem:[%s3772_s1 + $0x3e0] ss:$8 sps:$4 sm:$0xff]  }
  0x27   :  { %343 = vmatpush1.bf16.msra.mxu1 %v2742_v22 }
  0x28   :  { %344 = vmatprep.subr.bf16.mxu1 %v2747_v23  ;;  %596 = vmatpush1.bf16.msra.mxu0 %v2795_v56  ;;  %v2836_v56 = vld [vmem:[%s3772_s1 + $0x360] ss:$8 sps:$4 sm:$0xff]  }
  0x29   :  { %597 = vmatprep.subr.bf16.mxu0 %v2796_v57  ;;  %v2837_v57 = vld [vmem:[%s3772_s1 + $0x3f0] ss:$8 sps:$4 sm:$0xff]  }
  0x2b   :  { %345 = vmatpush1.bf16.msra.mxu1 %v2745_v24 }
  0x2c   :  { %346 = vmatprep.subr.bf16.mxu1 %v2750_v25  ;;  %598 = vmatpush1.bf16.msra.mxu0 %v2798_v58  ;;  %v2838_v58 = vld [vmem:[%s3772_s1 + $0x370] ss:$8 sps:$4 sm:$0xff]  }
  0x2d   :  { %599 = vmatprep.subr.bf16.mxu0 %v2799_v59  ;;  %v2839_v59 = vld [vmem:[%s3772_s1 + $0x400] ss:$8 sps:$4 sm:$0xff]  }
  0x2f   :  { %347 = vmatpush1.bf16.msra.mxu1 %v2748_v26  ;;  %v2817_v26 = vld [vmem:[%s3772_s1 + $0x2e4] ss:$8 sps:$4 sm:$0xff]  }
  0x30   :  { %348 = vmatprep.subr.bf16.mxu1 %v2753_v27  ;;  %600 = vmatpush1.bf16.msra.mxu0 %v2801_v60  ;;  %v2819_v27 = vld [vmem:[%s3772_s1 + $0x2e0] ss:$8 sps:$4 sm:$0xff]   ;;  %v3003_v60 = vmov 0.0  }
  0x31   :  { %601 = vmatprep.subr.bf16.mxu0 %v2802_v61  ;;  %v2840_v61 = vld [vmem:[%s3772_s1 + $0x410] ss:$8 sps:$4 sm:$0xff]  }
  0x33   :  { %349 = vmatpush1.bf16.msra.mxu1 %v2751_v28  ;;  %v2820_v28 = vld [vmem:[%s3772_s1 + $0x2f4] ss:$8 sps:$4 sm:$0xff]  }
  0x34   :  { %350 = vmatprep.subr.bf16.mxu1 %v2756_v29  ;;  %602 = vmatpush1.bf16.msra.mxu0 %v2804_v62  ;;  %v2822_v29 = vld [vmem:[%s3772_s1 + $0x2f0] ss:$8 sps:$4 sm:$0xff]   ;;  %v2841_v62 = vld [vmem:[%s3772_s1 + $0x420] ss:$8 sps:$4 sm:$0xff]  }
  0x35   :  { %603 = vmatprep.subr.bf16.mxu0 %v2805_v63  ;;  %v2842_v63 = vld [vmem:[%s3772_s1 + $0x430] ss:$8 sps:$4 sm:$0xff]  }
  0x37   :  { %351 = vmatpush1.bf16.msra.mxu1 %v2754_v30  ;;  %v2823_v30 = vld [vmem:[%s3772_s1 + $0x380] ss:$8 sps:$4 sm:$0xff]  }
  0x38   :  { %352 = vmatprep.subr.bf16.mxu1 %v2759_v31  ;;  %604 = vmatpush1.bf16.msra.mxu0 %v2807_v0  ;;  %v2824_v31 = vld [vmem:[%s3772_s1 + $0x300] ss:$8 sps:$4 sm:$0xff]  }
  0x39   :  { %605 = vmatprep.subr.bf16.mxu0 %v2808_v2  ;;  %v2843_v0 = vld [vmem:[%s3772_s1 + $0x440] ss:$8 sps:$4 sm:$0xff]   ;;  %v2844_v2 = vld [vmem:[%s3772_s1 + $0x450] ss:$8 sps:$4 sm:$0xff]  }
  0x3b   :  { %353 = vmatpush1.bf16.msra.mxu1 %v2757_v32  ;;  %v2825_v32 = vld [vmem:[%s3772_s1 + $0x390] ss:$8 sps:$4 sm:$0xff]  }
  0x3c   :  { %354 = vmatprep.subr.bf16.mxu1 %v2762_v33  ;;  %606 = vmatpush1.bf16.msra.mxu0 %v2810_v3  ;;  %v2826_v33 = vld [vmem:[%s3772_s1 + $0x310] ss:$8 sps:$4 sm:$0xff]   ;;  %v2186_v3 = vld [vmem:[%s3774_s2 + $0x2] ss:$8 sm:$0x3] }
  0x3d   :  { %607 = vmatprep.subr.bf16.mxu0 %v2811_v4  ;;  %v416_v4 = vrot.slane %v2186_v3, %v3238_v10 }
  0x3f   :  { %355 = vmatpush1.bf16.msra.mxu1 %v2760_v34  ;;  %v2827_v34 = vld [vmem:[%s3772_s1 + $0x3a0] ss:$8 sps:$4 sm:$0xff]  }
  0x40   :  { %356 = vmatprep.subr.bf16.mxu1 %v2765_v35  ;;  %608 = vmatpush1.bf16.msra.mxu0 %v2813_v5  ;;  %v2828_v35 = vld [vmem:[%s3772_s1 + $0x320] ss:$8 sps:$4 sm:$0xff]   ;;  %v420_v5 = vrot.slane %v2186_v3, %v3243_v13  ;;  %v2865_v3 = vld [vmem:[%s3772_s1 + $0x870] ss:$8 sps:$4 sm:$0xff]  }
  0x41   :  { %609 = vmatprep.subr.bf16.mxu0 %v2814_v6 }
  0x43   :  { %357 = vmatpush1.bf16.msra.mxu1 %v2763_v36  ;;  %v2829_v36 = vld [vmem:[%s3772_s1 + $0x3b0] ss:$8 sps:$4 sm:$0xff]  }
  0x44   :  { %358 = vmatprep.subr.bf16.mxu1 %v2768_v37  ;;  %610 = vmatpush1.bf16.msra.mxu0 %v2816_v7  ;;  %v2830_v37 = vld [vmem:[%s3772_s1 + $0x330] ss:$8 sps:$4 sm:$0xff]  }
  0x45   :  { %611 = vmatprep.subr.bf16.mxu0 %v2817_v26  ;;  %v2852_v26 = vld [vmem:[%s3772_s1 + $0x550] ss:$8 sps:$4 sm:$0xff]  }
  0x47   :  { %359 = vmatpush1.bf16.msra.mxu1 %v2766_v38  ;;  %v2831_v38 = vld [vmem:[%s3772_s1 + $0x3c0] ss:$8 sps:$4 sm:$0xff]  }
  0x48   :  { %360 = vmatprep.subr.bf16.mxu1 %v2771_v39  ;;  %612 = vmatpush1.bf16.msra.mxu0 %v2819_v27  ;;  %v2832_v39 = vld [vmem:[%s3772_s1 + $0x340] ss:$8 sps:$4 sm:$0xff]  }
  0x49   :  { %613 = vmatprep.subr.bf16.mxu0 %v2820_v28  ;;  %v659_v28 = vld [vmem:[%s3774_s2 + $0x3] ss:$0 sm:$0xff] }
  0x4b   :  { %361 = vmatpush1.bf16.msra.mxu1 %v2769_v40  ;;  %v2833_v40 = vld [vmem:[%s3772_s1 + $0x3d0] ss:$8 sps:$4 sm:$0xff]  }
  0x4c   :  { %362 = vmatprep.subr.bf16.mxu1 %v2774_v41  ;;  %614 = vmatpush1.bf16.msra.mxu0 %v2822_v29  ;;  %v2834_v41 = vld [vmem:[%s3772_s1 + $0x350] ss:$8 sps:$4 sm:$0xff]  }
  0x4d   :  { %2637 = vmatprep.subr.bf16.mxu0 %v3003_v60 }
  0x4f   :  { %363 = vmatpush1.bf16.msra.mxu1 %v2772_v42  ;;  %v2121_v42 = vld [vmem:[%s3774_s2 + $0x1] ss:$8 sm:$0x3] }
  0x50   :  { %2561 = vmatprep.subr.bf16.mxu1 %v2823_v30  ;;  %v165_v43 = vrot.slane %v2121_v42, %v3238_v10  ;;  %v169_v44 = vrot.slane %v2121_v42, %v3243_v13 }
  0xe5   :  { %v115_v16 = vpop.f32.mrb[0].mxu1 }
  0xe6   :  { %v116_v17 = vadd.f32 %v115_v16, %v30_v14  ;;  %v117_v18 = vpop.f32.mrb[1].mxu1 }
  0xe7   :  { %v118_v19 = vadd.f32 %v117_v18, %v34_v15  ;;  %v119_v20 = vpop.f32.mrb[2].mxu1 }
  0xe8   :  { %v122_v21 = vmax.f32 %v116_v17, 0.0  ;;  %v120_v22 = vpop.f32.mrb[3].mxu1  ;;  %v2846_v20 = vld [vmem:[%s3772_s1 + $0x470] ss:$8 sps:$4 sm:$0xff]  }
  0xe9   :  { %v123_v23 = vmax.f32 %v118_v19, 0.0  ;;  %v2845_v19 = vld [vmem:[%s3772_s1 + $0x460] ss:$8 sps:$4 sm:$0xff]   ;;  %v2848_v22 = vld [vmem:[%s3772_s1 + $0x510] ss:$8 sps:$4 sm:$0xff]  }
  0xea   :  { %v159_v25 = vpack.c.bf16 %v122_v21, %v122_v21  ;;  %v2847_v21 = vld [vmem:[%s3772_s1 + $0x500] ss:$8 sps:$4 sm:$0xff]  }
  0xeb   :  { %v160_v24 = vpack.c.bf16 %v123_v23, %v123_v23  ;;  %v2849_v23 = vld [vmem:[%s3772_s1 + $0x520] ss:$8 sps:$4 sm:$0xff]  }
  0xed   :  { %364 = vmatprep.mubr.bf16.mxu1 %v160_v24  ;;  %v2850_v24 = vld [vmem:[%s3772_s1 + $0x530] ss:$8 sps:$4 sm:$0xff]  }
  0xee   :  { %365 = vmatmul.mubr.bf16.vlgmr.msra.gmra.mrb[4].mxu1 %v159_v25  ;;  %v2851_v25 = vld [vmem:[%s3772_s1 + $0x540] ss:$8 sps:$4 sm:$0xff]  }
  0xef   :  { %2562 = vmatpush3.bf16.msra.mxu1 %v2824_v31 }
  0xf0   :  { %2563 = vmatprep.subr.bf16.mxu1 %v2825_v32 }
  0xf3   :  { %2564 = vmatpush3.bf16.msra.mxu1 %v2826_v33 }
  0xf4   :  { %2565 = vmatprep.subr.bf16.mxu1 %v2827_v34 }
  0xf7   :  { %2566 = vmatpush3.bf16.msra.mxu1 %v2828_v35 }
  0xf8   :  { %2567 = vmatprep.subr.bf16.mxu1 %v2829_v36  ;;  %v2853_v36 = vld [vmem:[%s3772_s1 + $0x560] ss:$8 sps:$4 sm:$0xff]  }
  0xfb   :  { %2568 = vmatpush3.bf16.msra.mxu1 %v2830_v37  ;;  %v2854_v37 = vld [vmem:[%s3772_s1 + $0x570] ss:$8 sps:$4 sm:$0xff]  }
  0xfc   :  { %2569 = vmatprep.subr.bf16.mxu1 %v2831_v38  ;;  %v2855_v38 = vld [vmem:[%s3772_s1 + $0x700] ss:$8 sps:$4 sm:$0xff]  }
  0xff   :  { %2570 = vmatpush3.bf16.msra.mxu1 %v2832_v39  ;;  %v2856_v39 = vld [vmem:[%s3772_s1 + $0x600] ss:$8 sps:$4 sm:$0xff]  }
 0x100   :  { %2571 = vmatprep.subr.bf16.mxu1 %v2833_v40  ;;  %v816_v40 = vld [vmem:[%s3774_s2 + $0x4] ss:$0 sm:$0xff] }
 0x103   :  { %2572 = vmatpush3.bf16.msra.mxu1 %v2834_v41 }
 0x104   :  { %2573 = vmatprep.subr.bf16.mxu1 %v2835_v55 }
 0x107   :  { %2574 = vmatpush3.bf16.msra.mxu1 %v2836_v56  ;;  %v2858_v56 = vld [vmem:[%s3772_s1 + $0x800] ss:$8 sps:$4 sm:$0xff]  }
 0x108   :  { %2575 = vmatprep.subr.bf16.mxu1 %v2837_v57 }
 0x10b   :  { %2576 = vmatpush3.bf16.msra.mxu1 %v2838_v58 }
 0x10c   :  { %2657 = vmatprep.subr.bf16.mxu1 %v3003_v60 }
 0x1c1   :  { %v366_v45 = vpop.f32.mrb[4].mxu1 }
 0x1c2   :  { %v367_v46 = vadd.f32 %v366_v45, %v165_v43  ;;  %v368_v47 = vpop.f32.mrb[5].mxu1 }
 0x1c3   :  { %v369_v48 = vadd.f32 %v368_v47, %v169_v44  ;;  %v370_v49 = vpop.f32.mrb[6].mxu1 }
 0x1c4   :  { %v373_v50 = vmax.f32 %v367_v46, 0.0  ;;  %v371_v51 = vpop.f32.mrb[7].mxu1 }
 0x1c5   :  { %v374_v52 = vmax.f32 %v369_v48, 0.0 }
 0x1c6   :  { %v410_v54 = vpack.c.bf16 %v373_v50, %v373_v50 }
 0x1c7   :  { %v411_v53 = vpack.c.bf16 %v374_v52, %v374_v52  ;;  %v924_v52 = vld [vmem:[%s3774_s2 + $0x5] ss:$0 sm:$0xff] }
 0x1c9   :  { %615 = vmatprep.mubr.bf16.mxu0 %v411_v53 }
 0x1ca   :  { %616 = vmatmul.mubr.bf16.vlgmr.msra.gmra.mrb[0].mxu0 %v410_v54 }
 0x1cb   :  { %2638 = vmatpush3.bf16.msra.mxu0 %v2839_v59  ;;  %2653 = vmatprep.mubr.msk.bf16.mxu0 %vm3004_vm1, %v3003_v60  ;;  %v2859_v59 = vld [vmem:[%s3772_s1 + $0x810] ss:$8 sps:$4 sm:$0xff]  }
 0x1cc   :  { %2639 = vmatprep.subr.bf16.mxu0 %v3003_v60 }
 0x1cf   :  { %2640 = vmatpush3.bf16.msra.mxu0 %v2840_v61  ;;  %v2860_v61 = vld [vmem:[%s3772_s1 + $0x820] ss:$8 sps:$4 sm:$0xff]  }
 0x1d0   :  { %2641 = vmatprep.subr.bf16.mxu0 %v3003_v60 }
 0x1d3   :  { %2642 = vmatpush3.bf16.msra.mxu0 %v2841_v62  ;;  %v2861_v62 = vld [vmem:[%s3772_s1 + $0x830] ss:$8 sps:$4 sm:$0xff]  }
 0x1d4   :  { %2643 = vmatprep.subr.bf16.mxu0 %v3003_v60 }
 0x1d7   :  { %2644 = vmatpush3.bf16.msra.mxu0 %v2842_v63  ;;  %v2862_v63 = vld [vmem:[%s3772_s1 + $0x840] ss:$8 sps:$4 sm:$0xff]  }
 0x1d8   :  { %2645 = vmatprep.subr.bf16.mxu0 %v3003_v60 }
 0x1db   :  { %2646 = vmatpush3.bf16.msra.mxu0 %v2843_v0  ;;  %v2863_v0 = vld [vmem:[%s3772_s1 + $0x850] ss:$8 sps:$4 sm:$0xff]  }
 0x1dc   :  { %2647 = vmatprep.subr.bf16.mxu0 %v3003_v60 }
 0x1df   :  { %2648 = vmatpush3.bf16.msra.mxu0 %v2844_v2  ;;  %v2864_v2 = vld [vmem:[%s3772_s1 + $0x860] ss:$8 sps:$4 sm:$0xff]  }
 0x1e0   :  { %2649 = vmatprep.subr.bf16.mxu0 %v3003_v60 }
 0x1e3   :  { %2650 = vmatpush3.bf16.msra.mxu0 %v2845_v19  ;;  %v2886_v19 = vld [vmem:[%s3772_s1 + $0x964] ss:$8 sps:$4 sm:$0xff]  }
 0x1e4   :  { %2651 = vmatprep.subr.bf16.mxu0 %v3003_v60 }
 0x1e7   :  { %2652 = vmatpush3.bf16.msra.mxu0 %v2846_v20  ;;  %v2884_v20 = vld [vmem:[%s3772_s1 + $0x960] ss:$8 sps:$4 sm:$0xff]  }
 0x1e8   :  { %2677 = vmatprep.subr.bf16.mxu0 %v3003_v60 }
 0x29d   :  { %v617_v6 = vpop.f32.mrb[0].mxu0 }
 0x29e   :  { %v618_v7 = vadd.f32 %v617_v6, %v416_v4  ;;  %v619_v8 = vpop.f32.mrb[1].mxu0  ;;  %v2866_v4 = vld [vmem:[%s3772_s1 + $0x900] ss:$8 sps:$4 sm:$0xff]   ;;  %v2871_v6 = vld [vmem:[%s3772_s1 + $0x914] ss:$8 sps:$4 sm:$0xff]  }
 0x29f   :  { %v620_v9 = vadd.f32 %v619_v8, %v420_v5  ;;  %v621_v12 = vpop.f32.mrb[2].mxu0  ;;  %v2868_v5 = vld [vmem:[%s3772_s1 + $0x904] ss:$8 sps:$4 sm:$0xff]  }
 0x2a0   :  { %v624_v14 = vmax.f32 %v618_v7, 0.0  ;;  %v622_v15 = vpop.f32.mrb[3].mxu0  ;;  %v2869_v7 = vld [vmem:[%s3772_s1 + $0x910] ss:$8 sps:$4 sm:$0xff]   ;;  %v2874_v8 = vld [vmem:[%s3772_s1 + $0x924] ss:$8 sps:$4 sm:$0xff]  }
 0x2a1   :  { %v625_v16 = vmax.f32 %v620_v9, 0.0  ;;  %v2872_v9 = vld [vmem:[%s3772_s1 + $0x920] ss:$8 sps:$4 sm:$0xff]   ;;  %v2877_v12 = vld [vmem:[%s3772_s1 + $0x934] ss:$8 sps:$4 sm:$0xff]  }
 0x2a2   :  { %v660_v18 = vpack.c.bf16 %v624_v14, %v624_v14  ;;  %v2875_v14 = vld [vmem:[%s3772_s1 + $0x930] ss:$8 sps:$4 sm:$0xff]   ;;  %v2880_v15 = vld [vmem:[%s3772_s1 + $0x944] ss:$8 sps:$4 sm:$0xff]  }
 0x2a3   :  { %v661_v17 = vpack.c.bf16 %v625_v16, %v625_v16  ;;  %v2878_v16 = vld [vmem:[%s3772_s1 + $0x940] ss:$8 sps:$4 sm:$0xff]  }
 0x2a5   :  { %790 = vmatprep.mubr.bf16.mxu1 %v661_v17  ;;  %v2883_v17 = vld [vmem:[%s3772_s1 + $0x954] ss:$8 sps:$4 sm:$0xff]  }
 0x2a6   :  { %791 = vmatmul.mubr.bf16.vlgmr.msra.gmra.mrb[8].mxu1 %v660_v18  ;;  %v2881_v18 = vld [vmem:[%s3772_s1 + $0x950] ss:$8 sps:$4 sm:$0xff]  }
 0x2a7   :  { %2673 = vmatprep.mubr.msk.bf16.mxu1 %vm3004_vm1, %v3003_v60  ;;  %2658 = vmatpush3.bf16.msra.mxu1 %v2847_v21 }
 0x2a8   :  { %2659 = vmatprep.subr.bf16.mxu1 %v3003_v60 }
 0x2ab   :  { %2660 = vmatpush3.bf16.msra.mxu1 %v2848_v22  ;;  %v1128_v22 = vld [vmem:[%s3774_s2 + $0x6] ss:$0 sm:$0xff] }
 0x2ac   :  { %2661 = vmatprep.subr.bf16.mxu1 %v3003_v60 }
 0x2af   :  { %2662 = vmatpush3.bf16.msra.mxu1 %v2849_v23 }
 0x2b0   :  { %2663 = vmatprep.subr.bf16.mxu1 %v3003_v60 }
 0x2b3   :  { %2664 = vmatpush3.bf16.msra.mxu1 %v2850_v24 }
 0x2b4   :  { %2665 = vmatprep.subr.bf16.mxu1 %v3003_v60 }
 0x2b7   :  { %2666 = vmatpush3.bf16.msra.mxu1 %v2851_v25 }
 0x2b8   :  { %2667 = vmatprep.subr.bf16.mxu1 %v3003_v60 }
 0x2bb   :  { %2668 = vmatpush3.bf16.msra.mxu1 %v2852_v26 }
 0x2bc   :  { %2669 = vmatprep.subr.bf16.mxu1 %v3003_v60 }
 0x2bf   :  { %2670 = vmatpush3.bf16.msra.mxu1 %v2853_v36  ;;  %v2898_v36 = vld [vmem:[%s3772_s1 + $0xa24] ss:$8 sps:$4 sm:$0xff]  }
 0x2c0   :  { %2671 = vmatprep.subr.bf16.mxu1 %v3003_v60 }
 0x2c3   :  { %2672 = vmatpush3.bf16.msra.mxu1 %v2854_v37  ;;  %v2896_v37 = vld [vmem:[%s3772_s1 + $0xa20] ss:$8 sps:$4 sm:$0xff]  }
 0x2c4   :  { %1350 = vmatprep.subr.bf16.mxu1 %v2868_v5  ;;  %v2932_v5 = vld [vmem:[%s3772_s1 + $0xae0] ss:$8 sps:$4 sm:$0xff]  }
 0x379   :  { %v2577_v27 = vpop.f32.mrb[8].mxu1 }
 0x37a   :  { %v2578_v29 = vpop.f32.mrb[9].mxu1 }
 0x37b   :  { %v2579_v30 = vadd.f32 %v2578_v29, %v2577_v27  ;;  %v2580_v31 = vpop.f32.mrb[10].mxu1 }
 0x37c   :  { %v2581_v32 = vpop.f32.mrb[11].mxu1  ;;  %v2887_v31 = vld [vmem:[%s3772_s1 + $0x970] ss:$8 sps:$4 sm:$0xff]  }
 0x37d   :  { %v793_v33 = vadd.f32 %v2579_v30, %v659_v28  ;;  %v2889_v30 = vld [vmem:[%s3772_s1 + $0x974] ss:$8 sps:$4 sm:$0xff]   ;;  %v2890_v32 = vld [vmem:[%s3772_s1 + $0xa00] ss:$8 sps:$4 sm:$0xff]  }
 0x37f   :  { %v798_v34 = vmax.f32 %v793_v33, 0.0  ;;  %v2892_v33 = vld [vmem:[%s3772_s1 + $0xa04] ss:$8 sps:$4 sm:$0xff]  }
 0x381   :  { %v817_v35 = vpack.c.bf16 %v798_v34, %v798_v34  ;;  %v2895_v34 = vld [vmem:[%s3772_s1 + $0xa14] ss:$8 sps:$4 sm:$0xff]  }
 0x383   :  { %2654 = vmatmul.mubr.bf16.vlgmr.msra.gmra.mrb[4].mxu0 %v817_v35  ;;  %v2893_v35 = vld [vmem:[%s3772_s1 + $0xa10] ss:$8 sps:$4 sm:$0xff]  }
 0x384   :  { %2679 = vmatprep.mubr.msk.bf16.mxu0 %vm3004_vm1, %v3003_v60  ;;  %2678 = vmatpush3.bf16.msra.mxu0 %v2855_v38  ;;  %v2901_v38 = vld [vmem:[%s3772_s1 + $0xa34] ss:$8 sps:$4 sm:$0xff]  }
 0x385   :  { %2683 = vmatprep.subr.bf16.mxu0 %v3003_v60 }
 0x38b   :  { %2680 = vmatmul.mubr.msk.bf16.vlgmr.msra.gmra.mrb[8].mxu0 %vm1029_vm2, %v3057_v11  ;;  %v2857_v11 = vld [vmem:[%s3772_s1 + $0x610] ss:$8 sps:$4 sm:$0xff]  }
 0x38c   :  { %2684 = vmatpush3.bf16.msra.mxu0 %v2856_v39  ;;  %2687 = vmatprep.mubr.msk.bf16.mxu0 %vm3004_vm1, %v3003_v60  ;;  %v2899_v39 = vld [vmem:[%s3772_s1 + $0xa30] ss:$8 sps:$4 sm:$0xff]  }
 0x38d   :  { %2685 = vmatprep.subr.bf16.mxu0 %v3003_v60 }
 0x390   :  { %2686 = vmatpush3.bf16.msra.mxu0 %v2857_v11  ;;  %v2916_v11 = vld [vmem:[%s3772_s1 + $0xa84] ss:$8 sps:$4 sm:$0xff]  }
 0x391   :  { %2691 = vmatprep.subr.bf16.mxu0 %v3003_v60 }
 0x456   :  { %v900_v41 = vpop.f32.mrb[4].mxu0 }
 0x457   :  { %v901_v42 = vadd.f32 %v900_v41, %v816_v40  ;;  %v2655_v43 = vpop.f32.mrb[5].mxu0  ;;  %v2904_v40 = vld [vmem:[%s3772_s1 + $0xa44] ss:$8 sps:$4 sm:$0xff]   ;;  %v2902_v41 = vld [vmem:[%s3772_s1 + $0xa40] ss:$8 sps:$4 sm:$0xff]  }
 0x458   :  { %v903_v44 = vpop.f32.mrb[6].mxu0  ;;  %v2905_v43 = vld [vmem:[%s3772_s1 + $0xa50] ss:$8 sps:$4 sm:$0xff]  }
 0x459   :  { %v906_v45 = vmax.f32 %v901_v42, 0.0  ;;  %v2656_v46 = vpop.f32.mrb[7].mxu0  ;;  %v2907_v42 = vld [vmem:[%s3772_s1 + $0xa54] ss:$8 sps:$4 sm:$0xff]   ;;  %v2910_v44 = vld [vmem:[%s3772_s1 + $0xa64] ss:$8 sps:$4 sm:$0xff]  }
 0x45a   :  { %v2913_v46 = vld [vmem:[%s3772_s1 + $0xa74] ss:$8 sps:$4 sm:$0xff]  }
 0x45b   :  { %v925_v47 = vpack.c.bf16 %v906_v45, %v906_v45  ;;  %v2908_v45 = vld [vmem:[%s3772_s1 + $0xa60] ss:$8 sps:$4 sm:$0xff]  }
 0x45d   :  { %2674 = vmatmul.mubr.bf16.vlgmr.msra.gmra.mrb[12].mxu1 %v925_v47  ;;  %v2911_v47 = vld [vmem:[%s3772_s1 + $0xa70] ss:$8 sps:$4 sm:$0xff]  }
 0x45e   :  { %1382 = vmatprep.mubr.bf16.mxu1 %v3002_v1  ;;  %v3410_v48 = vpop.f32.mrb[8].mxu0  ;;  %1351 = vmatpush1.bf16.msra.mxu1 %v2866_v4  ;;  %v2934_v4 = vld [vmem:[%s3772_s1 + $0xae4] ss:$8 sps:$4 sm:$0xff]  }
 0x45f   :  { %v2681_v49 = vpop.f32.mrb[9].mxu0  ;;  %1352 = vmatprep.subr.bf16.mxu1 %v2871_v6  ;;  %v2937_v6 = vld [vmem:[%s3772_s1 + $0xaf4] ss:$8 sps:$4 sm:$0xff]  }
 0x460   :  { %v1069_v50 = vpop.f32.mrb[10].mxu0  ;;  %v2919_v49 = vld [vmem:[%s3772_s1 + $0xa94] ss:$8 sps:$4 sm:$0xff]  }
 0x461   :  { %v2682_v51 = vpop.f32.mrb[11].mxu0  ;;  %v2917_v50 = vld [vmem:[%s3772_s1 + $0xa90] ss:$8 sps:$4 sm:$0xff]  }
 0x462   :  { %1353 = vmatpush1.bf16.msra.mxu1 %v2869_v7  ;;  %v2922_v51 = vld [vmem:[%s3772_s1 + $0xaa4] ss:$8 sps:$4 sm:$0xff]   ;;  %v2935_v7 = vld [vmem:[%s3772_s1 + $0xaf0] ss:$8 sps:$4 sm:$0xff]  }
 0x463   :  { %1354 = vmatprep.subr.bf16.mxu1 %v2874_v8  ;;  %v2938_v8 = vld [vmem:[%s3772_s1 + $0xb00] ss:$8 sps:$4 sm:$0xff]  }
 0x466   :  { %1355 = vmatpush1.bf16.msra.mxu1 %v2872_v9  ;;  %v2940_v9 = vld [vmem:[%s3772_s1 + $0xb04] ss:$8 sps:$4 sm:$0xff]  }
 0x467   :  { %1356 = vmatprep.subr.bf16.mxu1 %v2877_v12  ;;  %v2943_v12 = vld [vmem:[%s3772_s1 + $0xb14] ss:$8 sps:$4 sm:$0xff]  }
 0x46a   :  { %1357 = vmatpush1.bf16.msra.mxu1 %v2875_v14  ;;  %v2941_v14 = vld [vmem:[%s3772_s1 + $0xb10] ss:$8 sps:$4 sm:$0xff]  }
 0x46b   :  { %1358 = vmatprep.subr.bf16.mxu1 %v2880_v15  ;;  %v2946_v15 = vld [vmem:[%s3772_s1 + $0xb24] ss:$8 sps:$4 sm:$0xff]  }
 0x46e   :  { %1359 = vmatpush1.bf16.msra.mxu1 %v2878_v16  ;;  %v2944_v16 = vld [vmem:[%s3772_s1 + $0xb20] ss:$8 sps:$4 sm:$0xff]  }
 0x46f   :  { %1360 = vmatprep.subr.bf16.mxu1 %v2883_v17  ;;  %v2949_v17 = vld [vmem:[%s3772_s1 + $0xb34] ss:$8 sps:$4 sm:$0xff]  }
 0x472   :  { %1361 = vmatpush1.bf16.msra.mxu1 %v2881_v18  ;;  %v2947_v18 = vld [vmem:[%s3772_s1 + $0xb30] ss:$8 sps:$4 sm:$0xff]  }
 0x473   :  { %1362 = vmatprep.subr.bf16.mxu1 %v2886_v19  ;;  %v2952_v19 = vld [vmem:[%s3772_s1 + $0xb44] ss:$8 sps:$4 sm:$0xff]  }
 0x476   :  { %1363 = vmatpush1.bf16.msra.mxu1 %v2884_v20  ;;  %v2950_v20 = vld [vmem:[%s3772_s1 + $0xb40] ss:$8 sps:$4 sm:$0xff]  }
 0x477   :  { %1364 = vmatprep.subr.bf16.mxu1 %v2889_v30  ;;  %v2965_v30 = vld [vmem:[%s3772_s1 + $0xb90] ss:$8 sps:$4 sm:$0xff]  }
 0x47a   :  { %1365 = vmatpush1.bf16.msra.mxu1 %v2887_v31  ;;  %v2970_v31 = vld [vmem:[%s3772_s1 + $0xba4] ss:$8 sps:$4 sm:$0xff]  }
 0x47b   :  { %1852 = vmatprep.subr.bf16.mxu1 %v2940_v9 }
 0x530   :  { %v1008_v53 = vpop.f32.mrb[12].mxu1 }
 0x531   :  { %v1009_v54 = vadd.f32 %v1008_v53, %v924_v52  ;;  %v2675_v55 = vpop.f32.mrb[13].mxu1  ;;  %v2920_v52 = vld [vmem:[%s3772_s1 + $0xaa0] ss:$8 sps:$4 sm:$0xff]   ;;  %v2925_v53 = vld [vmem:[%s3772_s1 + $0xab4] ss:$8 sps:$4 sm:$0xff]  }
 0x532   :  { %v1011_v1 = vpop.f32.mrb[14].mxu1  ;;  %v2928_v55 = vld [vmem:[%s3772_s1 + $0xac4] ss:$8 sps:$4 sm:$0xff]  }
 0x533   :  { %v1022_v57 = vpack.c.bf16 %v1009_v54, %v1009_v54  ;;  %v2676_v58 = vpop.f32.mrb[15].mxu1  ;;  %2069 = vrot.lane.b32.xlu0 %v1009_v54, %s3005_s18  ;;  %v2923_v54 = vld [vmem:[%s3772_s1 + $0xab0] ss:$8 sps:$4 sm:$0xff]   ;;  %v2926_v1 = vld [vmem:[%s3772_s1 + $0xac0] ss:$8 sps:$4 sm:$0xff]  }
 0x534   :  { %v1148_v58 = vld [vmem:[%s3774_s2 + $0x7] ss:$0 sm:$0xff] }
 0x535   :  { %2688 = vmatmul.mubr.msk.bf16.vlgmr.msra.gmra.mrb[12].mxu0 %vm1084_vm3, %v1022_v57  ;;  %v2929_v57 = vld [vmem:[%s3772_s1 + $0xad0] ss:$8 sps:$4 sm:$0xff]  }
 0x536   :  { %2692 = vmatpush3.bf16.msra.mxu0 %v2858_v56  ;;  %2707 = vmatprep.mubr.msk.bf16.mxu0 %vm3004_vm1, %v3003_v60  ;;  %v2931_v56 = vld [vmem:[%s3772_s1 + $0xad4] ss:$8 sps:$4 sm:$0xff]  }
 0x537   :  { %2693 = vmatprep.subr.bf16.mxu0 %v3003_v60 }
 0x53a   :  { %2694 = vmatpush3.bf16.msra.mxu0 %v2859_v59 }
 0x53b   :  { %2695 = vmatprep.subr.bf16.mxu0 %v3003_v60 }
 0x53e   :  { %2696 = vmatpush3.bf16.msra.mxu0 %v2860_v61 }
 0x53f   :  { %2697 = vmatprep.subr.bf16.mxu0 %v3003_v60 }
 0x542   :  { %2698 = vmatpush3.bf16.msra.mxu0 %v2861_v62 }
 0x543   :  { %2699 = vmatprep.subr.bf16.mxu0 %v3003_v60 }
 0x546   :  { %2700 = vmatpush3.bf16.msra.mxu0 %v2862_v63 }
 0x547   :  { %2701 = vmatprep.subr.bf16.mxu0 %v3003_v60 }
 0x54a   :  { %2702 = vmatpush3.bf16.msra.mxu0 %v2863_v0 }
 0x54b   :  { %2703 = vmatprep.subr.bf16.mxu0 %v3003_v60 }
 0x54e   :  { %2704 = vmatpush3.bf16.msra.mxu0 %v2864_v2 }
 0x54f   :  { %2705 = vmatprep.subr.bf16.mxu0 %v3003_v60 }
 0x552   :  { %2706 = vmatpush3.bf16.msra.mxu0 %v2865_v3 }
 0x553   :  { %1601 = vmatprep.subr.bf16.mxu0 %v2892_v33  ;;  %v2973_v33 = vld [vmem:[%s3772_s1 + $0xbb4] ss:$8 sps:$4 sm:$0xff]  }
 0x608   :  { %v1122_v21 = vpop.f32.mrb[12].mxu0 }
 0x609   :  { %v1123_v23 = vadd.f32 %v1122_v21, %v3410_v48  ;;  %v2689_v24 = vpop.f32.mrb[13].mxu0  ;;  %v2914_v48 = vld [vmem:[%s3772_s1 + $0xa80] ss:$8 sps:$4 sm:$0xff]   ;;  %v2955_v21 = vld [vmem:[%s3772_s1 + $0xb54] ss:$8 sps:$4 sm:$0xff]  }
 0x60a   :  { %v1125_v25 = vpop.f32.mrb[14].mxu0  ;;  %v2956_v24 = vld [vmem:[%s3772_s1 + $0xb60] ss:$8 sps:$4 sm:$0xff]  }
 0x60b   :  { %v1129_v26 = vadd.f32 %v1128_v22, %v1123_v23  ;;  %v2690_v27 = vpop.f32.mrb[15].mxu0  ;;  %v2953_v22 = vld [vmem:[%s3772_s1 + $0xb50] ss:$8 sps:$4 sm:$0xff]   ;;  %v2958_v23 = vld [vmem:[%s3772_s1 + $0xb64] ss:$8 sps:$4 sm:$0xff]  }
 0x60c   :  { %v2961_v25 = vld [vmem:[%s3772_s1 + $0xb74] ss:$8 sps:$4 sm:$0xff]   ;;  %v2964_v27 = vld [vmem:[%s3772_s1 + $0xb84] ss:$8 sps:$4 sm:$0xff]  }
 0x60d   :  { %v1130_v28 = vmax.f32 %v1129_v26, 0.0  ;;  %v2959_v26 = vld [vmem:[%s3772_s1 + $0xb70] ss:$8 sps:$4 sm:$0xff]  }
 0x60f   :  { %v1149_v29 = vpack.c.bf16 %v1130_v28, %v1130_v28  ;;  %v2962_v28 = vld [vmem:[%s3772_s1 + $0xb80] ss:$8 sps:$4 sm:$0xff]  }
 0x611   :  { %2708 = vmatmul.mubr.bf16.vlgmr.msra.gmra.mrb[16].mxu0 %v1149_v29  ;;  %v2967_v29 = vld [vmem:[%s3772_s1 + $0xb94] ss:$8 sps:$4 sm:$0xff]  }
 0x612   :  { %1602 = vmatpush1.bf16.msra.mxu0 %v2890_v32  ;;  %v2968_v32 = vld [vmem:[%s3772_s1 + $0xba0] ss:$8 sps:$4 sm:$0xff]  }
 0x613   :  { %1603 = vmatprep.subr.bf16.mxu0 %v2895_v34  ;;  %v2971_v34 = vld [vmem:[%s3772_s1 + $0xbb0] ss:$8 sps:$4 sm:$0xff]  }
 0x616   :  { %1604 = vmatpush1.bf16.msra.mxu0 %v2893_v35  ;;  %v2976_v35 = vld [vmem:[%s3772_s1 + $0xbc4] ss:$8 sps:$4 sm:$0xff]  }
 0x617   :  { %1605 = vmatprep.subr.bf16.mxu0 %v2898_v36  ;;  %v2974_v36 = vld [vmem:[%s3772_s1 + $0xbc0] ss:$8 sps:$4 sm:$0xff]  }
 0x61a   :  { %1606 = vmatpush1.bf16.msra.mxu0 %v2896_v37  ;;  %v2979_v37 = vld [vmem:[%s3772_s1 + $0xbd4] ss:$8 sps:$4 sm:$0xff]  }
 0x61b   :  { %1607 = vmatprep.subr.bf16.mxu0 %v2901_v38  ;;  %v2977_v38 = vld [vmem:[%s3772_s1 + $0xbd0] ss:$8 sps:$4 sm:$0xff]  }
 0x61e   :  { %1608 = vmatpush1.bf16.msra.mxu0 %v2899_v39  ;;  %v2366_v39 = vld [vmem:[%s3774_s2 + $0x10] ss:$8 sm:$0x3] }
 0x61f   :  { %1609 = vmatprep.subr.bf16.mxu0 %v2904_v40  ;;  %v1263_v40 = vrot.slane %v2366_v39, %v3238_v10 }
 0x622   :  { %1610 = vmatpush1.bf16.msra.mxu0 %v2902_v41  ;;  %v1267_v41 = vrot.slane %v2366_v39, %v3243_v13 }
 0x623   :  { %1611 = vmatprep.subr.bf16.mxu0 %v2907_v42 }
 0x626   :  { %1612 = vmatpush1.bf16.msra.mxu0 %v2905_v43 }
 0x627   :  { %1613 = vmatprep.subr.bf16.mxu0 %v2910_v44 }
 0x62a   :  { %1614 = vmatpush1.bf16.msra.mxu0 %v2908_v45 }
 0x62b   :  { %1615 = vmatprep.subr.bf16.mxu0 %v2913_v46 }
 0x62e   :  { %1616 = vmatpush1.bf16.msra.mxu0 %v2911_v47 }
 0x62f   :  { %1617 = vmatprep.subr.bf16.mxu0 %v2916_v11 }
 0x632   :  { %1618 = vmatpush1.bf16.msra.mxu0 %v2914_v48 }
 0x633   :  { %1619 = vmatprep.subr.bf16.mxu0 %v2919_v49 }
 0x636   :  { %1620 = vmatpush1.bf16.msra.mxu0 %v2917_v50 }
 0x637   :  { %1621 = vmatprep.subr.bf16.mxu0 %v2922_v51  ;;  %v2982_v51 = vld [vmem:[%s3772_s1 + $0xbe4] ss:$8 sps:$4 sm:$0xff]  }
 0x63a   :  { %1622 = vmatpush1.bf16.msra.mxu0 %v2920_v52  ;;  %v2980_v52 = vld [vmem:[%s3772_s1 + $0xbe0] ss:$8 sps:$4 sm:$0xff]  }
 0x63b   :  { %1623 = vmatprep.subr.bf16.mxu0 %v2925_v53  ;;  %v2985_v53 = vld [vmem:[%s3772_s1 + $0xbf4] ss:$8 sps:$4 sm:$0xff]  }
 0x63e   :  { %1624 = vmatpush1.bf16.msra.mxu0 %v2923_v54  ;;  %v2983_v54 = vld [vmem:[%s3772_s1 + $0xbf0] ss:$8 sps:$4 sm:$0xff]  }
 0x63f   :  { %1625 = vmatprep.subr.bf16.mxu0 %v2928_v55  ;;  %v2986_v55 = vld [vmem:[%s3772_s1 + $0xc80] ss:$8 sps:$4 sm:$0xff]  }
 0x642   :  { %1626 = vmatpush1.bf16.msra.mxu0 %v2926_v1  ;;  %v2987_v1 = vld [vmem:[%s3772_s1 + $0xc00] ss:$8 sps:$4 sm:$0xff]  }
 0x643   :  { %1627 = vmatprep.subr.bf16.mxu0 %v2931_v56  ;;  %v2988_v56 = vld [vmem:[%s3772_s1 + $0xc90] ss:$8 sps:$4 sm:$0xff]  }
 0x646   :  { %1628 = vmatpush1.bf16.msra.mxu0 %v2929_v57  ;;  %v2989_v57 = vld [vmem:[%s3772_s1 + $0xc10] ss:$8 sps:$4 sm:$0xff]  }
 0x647   :  { %1629 = vmatprep.subr.bf16.mxu0 %v2934_v4  ;;  %v2415_v4 = vld [vmem:[%s3774_s2 + $0x11] ss:$8 sm:$0x3] }
 0x64a   :  { %1630 = vmatpush1.bf16.msra.mxu0 %v2932_v5  ;;  %v1434_v5 = vrot.slane %v2415_v4, %v3238_v10 }
 0x64b   :  { %1631 = vmatprep.subr.bf16.mxu0 %v2937_v6  ;;  %v1438_v6 = vrot.slane %v2415_v4, %v3243_v13 }
 0x64e   :  { %1632 = vmatpush1.bf16.msra.mxu0 %v2935_v7 }
 0x64f   :  { %2615 = vmatprep.subr.bf16.mxu0 %v2986_v55 }
 0x6e4   :  { %v1232_v59 = vpop.f32.mrb[16].mxu0 }
 0x6e5   :  { %v1233_v61 = vadd.f32 %v1232_v59, %v1148_v58  ;;  %v2709_v62 = vpop.f32.mrb[17].mxu0  ;;  %v2990_v58 = vld [vmem:[%s3772_s1 + $0xca0] ss:$8 sps:$4 sm:$0xff]  }
 0x6e6   :  { %v1235_v63 = vpop.f32.mrb[18].mxu0  ;;  %v2991_v59 = vld [vmem:[%s3772_s1 + $0xc20] ss:$8 sps:$4 sm:$0xff]   ;;  %v2993_v62 = vld [vmem:[%s3772_s1 + $0xc30] ss:$8 sps:$4 sm:$0xff]  }
 0x6e7   :  { %v1238_v0 = vmax.f32 %v1233_v61, 0.0  ;;  %v2710_v2 = vpop.f32.mrb[19].mxu0  ;;  %v2992_v61 = vld [vmem:[%s3772_s1 + $0xcb0] ss:$8 sps:$4 sm:$0xff]   ;;  %v2994_v63 = vld [vmem:[%s3772_s1 + $0xcc0] ss:$8 sps:$4 sm:$0xff]  }
 0x6e8   :  { %v2996_v2 = vld [vmem:[%s3772_s1 + $0xcd0] ss:$8 sps:$4 sm:$0xff]  }
 0x6e9   :  { %v1258_v3 = vpack.c.bf16 %v1238_v0, %v1238_v0  ;;  %v2995_v0 = vld [vmem:[%s3772_s1 + $0xc40] ss:$8 sps:$4 sm:$0xff]  }
 0x6eb   :  { %1383 = vmatmul.mubr.bf16.vlgmr.msra.gmra.mrb[16].mxu1 %v1258_v3  ;;  %v2997_v3 = vld [vmem:[%s3772_s1 + $0xc50] ss:$8 sps:$4 sm:$0xff]  }
 0x6ec   :  { %1853 = vmatpush1.bf16.msra.mxu1 %v2938_v8 }
 0x6ed   :  { %1854 = vmatprep.subr.bf16.mxu1 %v2943_v12 }
 0x6f0   :  { %1855 = vmatpush1.bf16.msra.mxu1 %v2941_v14 }
 0x6f1   :  { %1856 = vmatprep.subr.bf16.mxu1 %v2946_v15 }
 0x6f4   :  { %1857 = vmatpush1.bf16.msra.mxu1 %v2944_v16 }
 0x6f5   :  { %1858 = vmatprep.subr.bf16.mxu1 %v2949_v17 }
 0x6f8   :  { %1859 = vmatpush1.bf16.msra.mxu1 %v2947_v18 }
 0x6f9   :  { %1860 = vmatprep.subr.bf16.mxu1 %v2952_v19 }
 0x6fc   :  { %1861 = vmatpush1.bf16.msra.mxu1 %v2950_v20  ;;  %v2998_v20 = vld [vmem:[%s3772_s1 + $0xce0] ss:$8 sps:$4 sm:$0xff]  }
 0x6fd   :  { %1862 = vmatprep.subr.bf16.mxu1 %v2955_v21  ;;  %v2999_v21 = vld [vmem:[%s3772_s1 + $0xc60] ss:$8 sps:$4 sm:$0xff]  }
 0x700   :  { %1863 = vmatpush1.bf16.msra.mxu1 %v2953_v22  ;;  %v3000_v22 = vld [vmem:[%s3772_s1 + $0xcf0] ss:$8 sps:$4 sm:$0xff]  }
 0x701   :  { %1864 = vmatprep.subr.bf16.mxu1 %v2958_v23  ;;  %v3001_v23 = vld [vmem:[%s3772_s1 + $0xc70] ss:$8 sps:$4 sm:$0xff]  }
 0x704   :  { %1865 = vmatpush1.bf16.msra.mxu1 %v2956_v24  ;;  %v2480_v24 = vld [vmem:[%s3774_s2 + $0x12] ss:$8 sm:$0x3] }
 0x705   :  { %1866 = vmatprep.subr.bf16.mxu1 %v2961_v25  ;;  %v1685_v25 = vrot.slane %v2480_v24, %v3238_v10 }
 0x708   :  { %1867 = vmatpush1.bf16.msra.mxu1 %v2959_v26  ;;  %v1689_v26 = vrot.slane %v2480_v24, %v3243_v13 }
 0x709   :  { %1868 = vmatprep.subr.bf16.mxu1 %v2964_v27 }
 0x70c   :  { %1869 = vmatpush1.bf16.msra.mxu1 %v2962_v28 }
 0x70d   :  { %1870 = vmatprep.subr.bf16.mxu1 %v2967_v29 }
 0x710   :  { %1871 = vmatpush1.bf16.msra.mxu1 %v2965_v30 }
 0x711   :  { %1872 = vmatprep.subr.bf16.mxu1 %v2970_v31 }
 0x714   :  { %1873 = vmatpush1.bf16.msra.mxu1 %v2968_v32 }
 0x715   :  { %1874 = vmatprep.subr.bf16.mxu1 %v2973_v33 }
 0x718   :  { %1875 = vmatpush1.bf16.msra.mxu1 %v2971_v34 }
 0x719   :  { %1876 = vmatprep.subr.bf16.mxu1 %v2976_v35 }
 0x71c   :  { %1877 = vmatpush1.bf16.msra.mxu1 %v2974_v36 }
 0x71d   :  { %1878 = vmatprep.subr.bf16.mxu1 %v2979_v37 }
 0x720   :  { %1879 = vmatpush1.bf16.msra.mxu1 %v2977_v38  ;;  %v1928_v38 = vld [vmem:[%s3774_s2 + $0x13] ss:$0 sm:$0xff] }
 0x721   :  { %1880 = vmatprep.subr.bf16.mxu1 %v2982_v51 }
 0x724   :  { %1881 = vmatpush1.bf16.msra.mxu1 %v2980_v52 }
 0x725   :  { %1882 = vmatprep.subr.bf16.mxu1 %v2985_v53 }
 0x728   :  { %1883 = vmatpush1.bf16.msra.mxu1 %v2983_v54 }
 0x7be   :  { %v1384_v42 = vpop.f32.mrb[16].mxu1 }
 0x7bf   :  { %v1385_v43 = vadd.f32 %v1384_v42, %v1263_v40  ;;  %v1386_v44 = vpop.f32.mrb[17].mxu1  ;;  %v2070_v42 = vpop.permute.xlu0 %2069 }
 0x7c0   :  { %v1387_v45 = vadd.f32 %v1386_v44, %v1267_v41  ;;  %v1388_v46 = vpop.f32.mrb[18].mxu1 }
 0x7c1   :  { %v1391_v47 = vmax.f32 %v1385_v43, 0.0  ;;  %v1389_v11 = vpop.f32.mrb[19].mxu1 }
 0x7c2   :  { %v1392_v48 = vmax.f32 %v1387_v45, 0.0 }
 0x7c3   :  { %v1428_v50 = vpack.c.bf16 %v1391_v47, %v1391_v47 }
 0x7c4   :  { %v1429_v49 = vpack.c.bf16 %v1392_v48, %v1392_v48 }
 0x7c6   :  { %1633 = vmatprep.mubr.bf16.mxu0 %v1429_v49 }
 0x7c7   :  { %1634 = vmatmul.mubr.bf16.vlgmr.msra.gmra.mrb[20].mxu0 %v1428_v50 }
 0x7c8   :  { %2616 = vmatpush3.bf16.msra.mxu0 %v2987_v1 }
 0x7c9   :  { %2617 = vmatprep.subr.bf16.mxu0 %v2988_v56 }
 0x7cc   :  { %2618 = vmatpush3.bf16.msra.mxu0 %v2989_v57 }
 0x7cd   :  { %2619 = vmatprep.subr.bf16.mxu0 %v2990_v58 }
 0x7d0   :  { %2620 = vmatpush3.bf16.msra.mxu0 %v2991_v59 }
 0x7d1   :  { %2621 = vmatprep.subr.bf16.mxu0 %v2992_v61 }
 0x7d4   :  { %2622 = vmatpush3.bf16.msra.mxu0 %v2993_v62 }
 0x7d5   :  { %2623 = vmatprep.subr.bf16.mxu0 %v2994_v63 }
 0x7d8   :  { %2624 = vmatpush3.bf16.msra.mxu0 %v2995_v0 }
 0x7d9   :  { %2625 = vmatprep.subr.bf16.mxu0 %v2996_v2 }
 0x7dc   :  { %2626 = vmatpush3.bf16.msra.mxu0 %v2997_v3 }
 0x7dd   :  { %2627 = vmatprep.subr.bf16.mxu0 %v2998_v20 }
 0x7e0   :  { %2628 = vmatpush3.bf16.msra.mxu0 %v2999_v21 }
 0x7e1   :  { %2629 = vmatprep.subr.bf16.mxu0 %v3000_v22 }
 0x7e4   :  { %2630 = vmatpush3.bf16.msra.mxu0 %v3001_v23 }
 0x89a   :  { %v1635_v7 = vpop.f32.mrb[20].mxu0 }
 0x89b   :  { %v1636_v8 = vadd.f32 %v1635_v7, %v1434_v5  ;;  %v1637_v9 = vpop.f32.mrb[21].mxu0 }
 0x89c   :  { %v1638_v12 = vadd.f32 %v1637_v9, %v1438_v6  ;;  %v1639_v14 = vpop.f32.mrb[22].mxu0 }
 0x89d   :  { %v1642_v15 = vmax.f32 %v1636_v8, 0.0  ;;  %v1640_v16 = vpop.f32.mrb[23].mxu0 }
 0x89e   :  { %v1643_v17 = vmax.f32 %v1638_v12, 0.0 }
 0x89f   :  { %v1679_v19 = vpack.c.bf16 %v1642_v15, %v1642_v15 }
 0x8a0   :  { %v1680_v18 = vpack.c.bf16 %v1643_v17, %v1643_v17 }
 0x8a2   :  { %1884 = vmatprep.mubr.bf16.mxu1 %v1680_v18 }
 0x8a3   :  { %1885 = vmatmul.mubr.bf16.vlgmr.msra.gmra.mrb[20].mxu1 %v1679_v19 }
 0x976   :  { %v1886_v27 = vpop.f32.mrb[20].mxu1 }
 0x977   :  { %v1887_v28 = vadd.f32 %v1886_v27, %v1685_v25  ;;  %v1888_v29 = vpop.f32.mrb[21].mxu1 }
 0x978   :  { %v1889_v30 = vadd.f32 %v1888_v29, %v1689_v26  ;;  %v1890_v31 = vpop.f32.mrb[22].mxu1 }
 0x979   :  { %v1893_v32 = vmax.f32 %v1887_v28, 0.0  ;;  %v1891_v33 = vpop.f32.mrb[23].mxu1 }
 0x97a   :  { %v1894_v34 = vmax.f32 %v1889_v30, 0.0 }
 0x97b   :  { %v1929_v36 = vpack.c.bf16 %v1893_v32, %v1893_v32 }
 0x97c   :  { %v1930_v35 = vpack.c.bf16 %v1894_v34, %v1894_v34 }
 0x97e   :  { %2059 = vmatprep.mubr.bf16.mxu0 %v1930_v35 }
 0x97f   :  { %2060 = vmatmul.mubr.bf16.vlgmr.msra.gmra.mrb[24].mxu0 %v1929_v36 }
 0xa52   :  { %v2631_v37 = vpop.f32.mrb[24].mxu0 }
 0xa53   :  { %v2632_v10 = vpop.f32.mrb[25].mxu0 }
 0xa54   :  { %v2633_v39 = vadd.f32 %v2632_v10, %v2631_v37  ;;  %v2634_v13 = vpop.f32.mrb[26].mxu0 }
 0xa55   :  { %v2635_v40 = vpop.f32.mrb[27].mxu0 }
 0xa56   :  { %v2062_v41 = vadd.f32 %v2633_v39, %v1928_v38 }
 0xa58   :  { %2067 = vst.msk [vmem:[%s3775_s3] sm:$0xff] %vm77_vm0, %v2062_v41 }
 0xa59   :  { %2073 = vst.msk [vmem:[%s3775_s3] sm:$0xff] %vm2072_vm4, %v2070_v42 }
 0xa5a   :  { %2075 = vst.msk [vmem:[%s3775_s3] sm:$0xff] %vm2074_vm5, %v3003_v60 }

</bundles_post_ra>
